<compile_context>
chip_gen: v6e
topology: v6e:2x2x1
jax: 0.10.0
libtpu: 0.0.40
codegen_flags: <defaults>
</compile_context>

<pallas_src>
import numpy as np
import jax
import jax.numpy as jnp
from jax.experimental import pallas as pl
from jax.experimental.pallas import tpu as pltpu

# MXU operand dtype (accumulation is always f32). Set to jnp.float32 for a pure-f32 path.
MM_DTYPE = jnp.bfloat16


# ----------------------------------------------------------------------------
# One-time host-side weight expansion (runs outside jit)
# ----------------------------------------------------------------------------
def _expand_conv_weight(w_hwio, W):
    """Expand a (5,5,Cin,Cout) HWIO conv weight into 5 banded matmul matrices.

    Returns rhs of shape (5, Wp*Cin, 2*W2*Cout) with
        rhs[ky, jj*Cin+ci, pw*W2*Cout + jo*Cout + co] = w[ky, kx, ci, co],
        kx = jj - (2*jo + pw), zero outside 0 <= kx < 5,
    so that, for a padded input row xp[r] flattened as (W+4)*Cin (channels minor),
    sum_ky xp[r+ky] @ rhs[ky] is the pre-pool conv output row r, laid out as
    [pw, jo, co]: the two pool-column phases occupy the two halves of the lanes.
    """
    w = np.asarray(w_hwio, np.float32)
    KH, KW, Cin, Cout = w.shape
    W2, Wp = W // 2, W + 4
    rhs = np.zeros((KH, Wp, Cin, 2, W2, Cout), np.float32)
    for kx in range(KW):
        for pw in range(2):
            for jo in range(W2):
                rhs[:, 2 * jo + pw + kx, :, pw, jo, :] = w[:, kx, :, :]
    return jnp.asarray(rhs.reshape(KH, Wp * Cin, 2 * W2 * Cout), MM_DTYPE)


def prepare_kernel_params(params, H, W):
    """Pre-expand PyTorch-style params into the kernel-ready layout (host, once)."""
    kp = {"layers": []}
    h, w_sp = H, W
    for (w_conv, b) in params["convs"]:
        W2 = w_sp // 2
        kp["layers"].append({
            "rhs": _expand_conv_weight(w_conv, w_sp),                               # (5, Wp*Cin, 2*W2*Cout)
            "bias": jnp.asarray(np.tile(np.asarray(b, np.float32), W2)[None, :]),   # (1, W2*Cout) f32
        })
        h, w_sp = h // 2, W2
    # AdaptiveAvgPool2d((1,1)) + Flatten + Linear folded into one (W2_last*C, ch_out)
    # matrix applied to the column-sum of the last activation (1/(H*W) mean folded in).
    fc_scaled = np.asarray(params["fc_w"], np.float32) / float(h * w_sp)            # (C, ch_out)
    kp["head_w"] = jnp.asarray(np.tile(fc_scaled, (w_sp, 1)))                       # (W2_last*C, ch_out) f32
    kp["head_b"] = jnp.asarray(np.asarray(params["fc_b"], np.float32)[None, :])     # (1, ch_out)
    return kp


# ----------------------------------------------------------------------------
# Fused conv5x5(pad=2) + bias + ReLU + maxpool2x2 (+ optional avgpool/linear head)
# ----------------------------------------------------------------------------
def _make_conv_kernel(block_n, H2, W2C, fuse_head):
    """Per-grid-step kernel.

    x_ref   : (block_n, 2, H2+2, Wp*Cin)  padded input, rows split by parity,
                                          W and Cin merged into the lane dim
    rhs_ref : (5, Wp*Cin, 2*W2C)          expanded per-kernel-row conv weight (bf16)
    b_ref   : (1, W2C)                    conv bias tiled over pooled columns (f32)
    head only:
      p_ref   : (W2C, ch_out)             fc weight tiled over pooled columns / (H2*W2)
      fcb_ref : (1, ch_out)
    o_ref   : (block_n, H2, W2C)   or   (1, block_n, ch_out) when fuse_head
    """

    def one_sample(x_ref, rhs_ref, b_ref, s):
        phase_acc = []
        for ph in range(2):                      # pool-row phase: pre-pool row = 2*i + ph
            acc = None
            for ky in range(5):                  # conv kernel row
                a = ph + ky                      # padded-row offset = 2*i + a
                lhs = x_ref[s, a % 2, a // 2: a // 2 + H2, :].astype(MM_DTYPE)
                d = jnp.dot(lhs, rhs_ref[ky], preferred_element_type=jnp.float32)
                acc = d if acc is None else acc + d
            phase_acc.append(acc)                # (H2, 2*W2C), f32
        y = jnp.maximum(phase_acc[0], phase_acc[1])      # maxpool over rows (the 2 ph phases)
        y = jnp.maximum(y[:, :W2C], y[:, W2C:])          # maxpool over cols (the 2 lane halves)
        return jnp.maximum(y + b_ref[...], 0.0)          # bias + ReLU (f32)

    if not fuse_head:
        def kernel(x_ref, rhs_ref, b_ref, o_ref):
            for s in range(block_n):
                o_ref[s] = one_sample(x_ref, rhs_ref, b_ref, s).astype(o_ref.dtype)
        return kernel

    def kernel_head(x_ref, rhs_ref, b_ref, p_ref, fcb_ref, o_ref):
        rows = []
        for s in range(block_n):
            act = one_sample(x_ref, rhs_ref, b_ref, s)            # (H2, W2C)
            pooled = jnp.sum(act, axis=0, keepdims=True)          # (1, W2C); mean factor is in p_ref
            rows.append(jnp.dot(pooled, p_ref[...],
                                preferred_element_type=jnp.float32) + fcb_ref[...])
        o_ref[0] = jnp.concatenate(rows, axis=0).astype(o_ref.dtype)
    return kernel_head


def _prep_layer_input(x_nhwc):
    """(N,H,W,C) -> (N, 2, (H+4)//2, (W+4)*C): pad by 2, merge W & C into lanes,
    split padded rows by parity so every conv-row access in the kernel is a
    contiguous static slice (no strided loads on-chip)."""
    N, H, W, C = x_nhwc.shape
    xp = jnp.pad(x_nhwc, ((0, 0), (2, 2), (2, 2), (0, 0)))
    xp = xp.reshape(N, (H + 4) // 2, 2, (W + 4) * C)
    return xp.transpose(0, 2, 1, 3)


def _conv_layer(x_nhwc, layer, block_n, head=None):
    N, H, W, Cin = x_nhwc.shape
    assert H % 2 == 0 and W % 2 == 0 and N % block_n == 0
    H2, W2 = H // 2, W // 2
    WpC = (W + 4) * Cin
    rhs, bias = layer["rhs"], layer["bias"]
    assert rhs.shape[1] == WpC
    W2C = rhs.shape[2] // 2
    Cout = W2C // W2

    x_par = _prep_layer_input(x_nhwc)                       # (N, 2, H2+2, WpC)
    grid = (N // block_n,)
    kernel = _make_conv_kernel(block_n, H2, W2C, fuse_head=head is not None)
    x_spec = pl.BlockSpec((block_n, 2, H2 + 2, WpC), lambda n: (n, 0, 0, 0))
    rhs_spec = pl.BlockSpec(rhs.shape, lambda n: (0, 0, 0))
    b_spec = pl.BlockSpec((1, W2C), lambda n: (0, 0))
    cparams = pltpu.CompilerParams(dimension_semantics=("parallel",))

    if head is None:
        out = pl.pallas_call(
            kernel,
            out_shape=jax.ShapeDtypeStruct((N, H2, W2C), jnp.float32),
            grid=grid,
            in_specs=[x_spec, rhs_spec, b_spec],
            out_specs=pl.BlockSpec((block_n, H2, W2C), lambda n: (n, 0, 0)),
            compiler_params=cparams,
        )(x_par, rhs, bias)
        return out.reshape(N, H2, W2, Cout)                 # free re-interpretation in HBM

    head_w, head_b = head
    K = head_w.shape[-1]
    out = pl.pallas_call(
        kernel,
        out_shape=jax.ShapeDtypeStruct((grid[0], block_n, K), jnp.float32),
        grid=grid,
        in_specs=[x_spec, rhs_spec, b_spec,
                  pl.BlockSpec((W2C, K), lambda n: (0, 0)),
                  pl.BlockSpec((1, K), lambda n: (0, 0))],
        out_specs=pl.BlockSpec((1, block_n, K), lambda n: (n, 0, 0)),
        compiler_params=cparams,
    )(x_par, rhs, bias, head_w, head_b)
    return out.reshape(N, K)


# ----------------------------------------------------------------------------
# Full forward + parameters
# ----------------------------------------------------------------------------
def convnet_forward(x_nchw, kparams):
    x = jnp.transpose(x_nchw, (0, 2, 3, 1))                 # NCHW -> NHWC
    N = x.shape[0]
    # Keep >= 2 grid steps when possible so the "parallel" axis shards over v7x's 2 TCs.
    block_n = N // 2 if (N >= 2 and N % 2 == 0) else 1
    layers = kparams["layers"]
    assert len(layers) >= 1
    for li, layer in enumerate(layers):
        head = (kparams["head_w"], kparams["head_b"]) if li == len(layers) - 1 else None
        x = _conv_layer(x, layer, block_n, head=head)
    return x


def init_params(key, ch_in, hiddens, ch_out):
    params = {"convs": []}
    c = ch_in
    for hid in hiddens:
        key, k1, k2 = jax.random.split(key, 3)
        # PyTorch Conv2d weight is (out, in, kh, kw); store as (kh, kw, in, out) = HWIO
        w_oihw = jax.random.normal(k1, (hid, c, 5, 5), jnp.float32) / jnp.sqrt(25.0 * c)
        b = 0.05 * jax.random.normal(k2, (hid,), jnp.float32)
        params["convs"].append((jnp.transpose(w_oihw, (2, 3, 1, 0)), b))
        c = hid
    key, k1, k2 = jax.random.split(key, 3)
    # PyTorch Linear weight is (out, in); store as (in, out)
    w_fc = jax.random.normal(k1, (ch_out, c), jnp.float32) / jnp.sqrt(1.0 * c)
    b_fc = 0.05 * jax.random.normal(k2, (ch_out,), jnp.float32)
    params["fc_w"] = jnp.transpose(w_fc)
    params["fc_b"] = b_fc
    return params


def reference_forward(x_nchw, params):
    """Pure-JAX/XLA reference with PyTorch semantics (for validation)."""
    x = jnp.transpose(x_nchw, (0, 2, 3, 1))
    for w, b in params["convs"]:
        y = jax.lax.conv_general_dilated(
            x, w, window_strides=(1, 1), padding=((2, 2), (2, 2)),
            dimension_numbers=("NHWC", "HWIO", "NHWC"))
        y = jnp.maximum(y + b, 0.0)
        y = jax.lax.reduce_window(y, -jnp.inf, jax.lax.max,
                                  (1, 2, 2, 1), (1, 2, 2, 1), "VALID")
        x = y
    m = jnp.mean(x, axis=(1, 2))
    return m @ params["fc_w"] + params["fc_b"]


if __name__ == "__main__":
    N, CH_IN, H, W = 2, 4, 32, 32
    HIDDENS = (8, 16)
    CH_OUT = 10

    key = jax.random.PRNGKey(0)
    kx, kp = jax.random.split(key)
    x = jax.random.normal(kx, (N, CH_IN, H, W), jnp.float32)   # PyTorch-style NCHW input
    params = init_params(kp, CH_IN, HIDDENS, CH_OUT)
    kparams = prepare_kernel_params(params, H, W)              # one-time host-side expansion

    out = jax.block_until_ready(jax.jit(convnet_forward)(x, kparams))
    assert out.shape == (N, CH_OUT), out.shape

    ref = jax.block_until_ready(reference_forward(x, params))
    # bf16 MXU operands with f32 accumulation -> small quantization error vs. the f32 reference.
    if not np.allclose(np.asarray(out), np.asarray(ref), rtol=5e-2, atol=5e-2):
        raise AssertionError("Pallas ConvNet output mismatch vs JAX reference")

    print("KERNEL_OK")
</pallas_src>

<mosaic_0001>
module attributes {stable_mosaic.version = 11 : i64} {
  func.func @kernel(%arg0: i32, %arg1: memref<1x2x18x144xf32, #tpu.memory_space<vmem>>, %arg2: memref<5x144x256xbf16, #tpu.memory_space<vmem>>, %arg3: memref<1x128xf32, #tpu.memory_space<vmem>>, %arg4: memref<1x16x128xf32, #tpu.memory_space<vmem>>) attributes {dimension_semantics = [#tpu.dimension_semantics<parallel>], iteration_bounds = array<i64: 2>, scalar_prefetch = 0 : i64, scratch_operands = 0 : i64, tpu.core_type = #tpu.core_type<tc>, window_params = [{transform_indices = @transform_0, window_bounds = array<i64: 1, 2, 18, 144>}, {pipeline_mode = #tpu.pipeline_mode<synchronous>, transform_indices = @transform_1, window_bounds = array<i64: 5, 144, 256>}, {pipeline_mode = #tpu.pipeline_mode<synchronous>, transform_indices = @transform_2, window_bounds = array<i64: 1, 128>}, {transform_indices = @transform_3, window_bounds = array<i64: 1, 16, 128>}]} {
    %c0 = arith.constant 0 : index
    %c0_0 = arith.constant 0 : index
    %c0_1 = arith.constant 0 : index
    %c0_2 = arith.constant 0 : index
    %0 = vector.load %arg1[%c0, %c0_0, %c0_1, %c0_2] : memref<1x2x18x144xf32, #tpu.memory_space<vmem>>, vector<1x1x16x144xf32>
    %1 = vector.shape_cast %0 : vector<1x1x16x144xf32> to vector<16x144xf32>
    %2 = arith.truncf %1 : vector<16x144xf32> to vector<16x144xbf16>
    %c0_3 = arith.constant 0 : index
    %c0_4 = arith.constant 0 : index
    %c0_5 = arith.constant 0 : index
    %3 = vector.load %arg2[%c0_3, %c0_4, %c0_5] : memref<5x144x256xbf16, #tpu.memory_space<vmem>>, vector<1x144x256xbf16>
    %4 = vector.shape_cast %3 : vector<1x144x256xbf16> to vector<144x256xbf16>
    %cst = arith.constant dense<0.000000e+00> : vector<16x256xf32>
    %5 = tpu.matmul %2, %4, %cst {dimension_numbers = #tpu.dot_dimension_numbers<[1], [0], [0], [1], [0, 0, 1, 1], [], []>} : vector<16x144xbf16>, vector<144x256xbf16>, vector<16x256xf32> -> vector<16x256xf32>
    %c0_6 = arith.constant 0 : index
    %c1 = arith.constant 1 : index
    %c0_7 = arith.constant 0 : index
    %c0_8 = arith.constant 0 : index
    %6 = vector.load %arg1[%c0_6, %c1, %c0_7, %c0_8] : memref<1x2x18x144xf32, #tpu.memory_space<vmem>>, vector<1x1x16x144xf32>
    %7 = vector.shape_cast %6 : vector<1x1x16x144xf32> to vector<16x144xf32>
    %8 = arith.truncf %7 : vector<16x144xf32> to vector<16x144xbf16>
    %c1_9 = arith.constant 1 : index
    %c0_10 = arith.constant 0 : index
    %c0_11 = arith.constant 0 : index
    %9 = vector.load %arg2[%c1_9, %c0_10, %c0_11] : memref<5x144x256xbf16, #tpu.memory_space<vmem>>, vector<1x144x256xbf16>
    %10 = vector.shape_cast %9 : vector<1x144x256xbf16> to vector<144x256xbf16>
    %cst_12 = arith.constant dense<0.000000e+00> : vector<16x256xf32>
    %11 = tpu.matmul %8, %10, %cst_12 {dimension_numbers = #tpu.dot_dimension_numbers<[1], [0], [0], [1], [0, 0, 1, 1], [], []>} : vector<16x144xbf16>, vector<144x256xbf16>, vector<16x256xf32> -> vector<16x256xf32>
    %12 = arith.addf %5, %11 : vector<16x256xf32>
    %c0_13 = arith.constant 0 : index
    %c0_14 = arith.constant 0 : index
    %c1_15 = arith.constant 1 : index
    %c0_16 = arith.constant 0 : index
    %13 = vector.load %arg1[%c0_13, %c0_14, %c1_15, %c0_16] : memref<1x2x18x144xf32, #tpu.memory_space<vmem>>, vector<1x1x16x144xf32>
    %14 = vector.shape_cast %13 : vector<1x1x16x144xf32> to vector<16x144xf32>
    %15 = arith.truncf %14 : vector<16x144xf32> to vector<16x144xbf16>
    %c2 = arith.constant 2 : index
    %c0_17 = arith.constant 0 : index
    %c0_18 = arith.constant 0 : index
    %16 = vector.load %arg2[%c2, %c0_17, %c0_18] : memref<5x144x256xbf16, #tpu.memory_space<vmem>>, vector<1x144x256xbf16>
    %17 = vector.shape_cast %16 : vector<1x144x256xbf16> to vector<144x256xbf16>
    %cst_19 = arith.constant dense<0.000000e+00> : vector<16x256xf32>
    %18 = tpu.matmul %15, %17, %cst_19 {dimension_numbers = #tpu.dot_dimension_numbers<[1], [0], [0], [1], [0, 0, 1, 1], [], []>} : vector<16x144xbf16>, vector<144x256xbf16>, vector<16x256xf32> -> vector<16x256xf32>
    %19 = arith.addf %12, %18 : vector<16x256xf32>
    %c0_20 = arith.constant 0 : index
    %c1_21 = arith.constant 1 : index
    %c1_22 = arith.constant 1 : index
    %c0_23 = arith.constant 0 : index
    %20 = vector.load %arg1[%c0_20, %c1_21, %c1_22, %c0_23] : memref<1x2x18x144xf32, #tpu.memory_space<vmem>>, vector<1x1x16x144xf32>
    %21 = vector.shape_cast %20 : vector<1x1x16x144xf32> to vector<16x144xf32>
    %22 = arith.truncf %21 : vector<16x144xf32> to vector<16x144xbf16>
    %c3 = arith.constant 3 : index
    %c0_24 = arith.constant 0 : index
    %c0_25 = arith.constant 0 : index
    %23 = vector.load %arg2[%c3, %c0_24, %c0_25] : memref<5x144x256xbf16, #tpu.memory_space<vmem>>, vector<1x144x256xbf16>
    %24 = vector.shape_cast %23 : vector<1x144x256xbf16> to vector<144x256xbf16>
    %cst_26 = arith.constant dense<0.000000e+00> : vector<16x256xf32>
    %25 = tpu.matmul %22, %24, %cst_26 {dimension_numbers = #tpu.dot_dimension_numbers<[1], [0], [0], [1], [0, 0, 1, 1], [], []>} : vector<16x144xbf16>, vector<144x256xbf16>, vector<16x256xf32> -> vector<16x256xf32>
    %26 = arith.addf %19, %25 : vector<16x256xf32>
    %c0_27 = arith.constant 0 : index
    %c0_28 = arith.constant 0 : index
    %c2_29 = arith.constant 2 : index
    %c0_30 = arith.constant 0 : index
    %27 = vector.load %arg1[%c0_27, %c0_28, %c2_29, %c0_30] : memref<1x2x18x144xf32, #tpu.memory_space<vmem>>, vector<1x1x16x144xf32>
    %28 = vector.shape_cast %27 : vector<1x1x16x144xf32> to vector<16x144xf32>
    %29 = arith.truncf %28 : vector<16x144xf32> to vector<16x144xbf16>
    %c4 = arith.constant 4 : index
    %c0_31 = arith.constant 0 : index
    %c0_32 = arith.constant 0 : index
    %30 = vector.load %arg2[%c4, %c0_31, %c0_32] : memref<5x144x256xbf16, #tpu.memory_space<vmem>>, vector<1x144x256xbf16>
    %31 = vector.shape_cast %30 : vector<1x144x256xbf16> to vector<144x256xbf16>
    %cst_33 = arith.constant dense<0.000000e+00> : vector<16x256xf32>
    %32 = tpu.matmul %29, %31, %cst_33 {dimension_numbers = #tpu.dot_dimension_numbers<[1], [0], [0], [1], [0, 0, 1, 1], [], []>} : vector<16x144xbf16>, vector<144x256xbf16>, vector<16x256xf32> -> vector<16x256xf32>
    %33 = arith.addf %26, %32 : vector<16x256xf32>
    %c0_34 = arith.constant 0 : index
    %c1_35 = arith.constant 1 : index
    %c0_36 = arith.constant 0 : index
    %c0_37 = arith.constant 0 : index
    %34 = vector.load %arg1[%c0_34, %c1_35, %c0_36, %c0_37] : memref<1x2x18x144xf32, #tpu.memory_space<vmem>>, vector<1x1x16x144xf32>
    %35 = vector.shape_cast %34 : vector<1x1x16x144xf32> to vector<16x144xf32>
    %36 = arith.truncf %35 : vector<16x144xf32> to vector<16x144xbf16>
    %c0_38 = arith.constant 0 : index
    %c0_39 = arith.constant 0 : index
    %c0_40 = arith.constant 0 : index
    %37 = vector.load %arg2[%c0_38, %c0_39, %c0_40] : memref<5x144x256xbf16, #tpu.memory_space<vmem>>, vector<1x144x256xbf16>
    %38 = vector.shape_cast %37 : vector<1x144x256xbf16> to vector<144x256xbf16>
    %cst_41 = arith.constant dense<0.000000e+00> : vector<16x256xf32>
    %39 = tpu.matmul %36, %38, %cst_41 {dimension_numbers = #tpu.dot_dimension_numbers<[1], [0], [0], [1], [0, 0, 1, 1], [], []>} : vector<16x144xbf16>, vector<144x256xbf16>, vector<16x256xf32> -> vector<16x256xf32>
    %c0_42 = arith.constant 0 : index
    %c0_43 = arith.constant 0 : index
    %c1_44 = arith.constant 1 : index
    %c0_45 = arith.constant 0 : index
    %40 = vector.load %arg1[%c0_42, %c0_43, %c1_44, %c0_45] : memref<1x2x18x144xf32, #tpu.memory_space<vmem>>, vector<1x1x16x144xf32>
    %41 = vector.shape_cast %40 : vector<1x1x16x144xf32> to vector<16x144xf32>
    %42 = arith.truncf %41 : vector<16x144xf32> to vector<16x144xbf16>
    %c1_46 = arith.constant 1 : index
    %c0_47 = arith.constant 0 : index
    %c0_48 = arith.constant 0 : index
    %43 = vector.load %arg2[%c1_46, %c0_47, %c0_48] : memref<5x144x256xbf16, #tpu.memory_space<vmem>>, vector<1x144x256xbf16>
    %44 = vector.shape_cast %43 : vector<1x144x256xbf16> to vector<144x256xbf16>
    %cst_49 = arith.constant dense<0.000000e+00> : vector<16x256xf32>
    %45 = tpu.matmul %42, %44, %cst_49 {dimension_numbers = #tpu.dot_dimension_numbers<[1], [0], [0], [1], [0, 0, 1, 1], [], []>} : vector<16x144xbf16>, vector<144x256xbf16>, vector<16x256xf32> -> vector<16x256xf32>
    %46 = arith.addf %39, %45 : vector<16x256xf32>
    %c0_50 = arith.constant 0 : index
    %c1_51 = arith.constant 1 : index
    %c1_52 = arith.constant 1 : index
    %c0_53 = arith.constant 0 : index
    %47 = vector.load %arg1[%c0_50, %c1_51, %c1_52, %c0_53] : memref<1x2x18x144xf32, #tpu.memory_space<vmem>>, vector<1x1x16x144xf32>
    %48 = vector.shape_cast %47 : vector<1x1x16x144xf32> to vector<16x144xf32>
    %49 = arith.truncf %48 : vector<16x144xf32> to vector<16x144xbf16>
    %c2_54 = arith.constant 2 : index
    %c0_55 = arith.constant 0 : index
    %c0_56 = arith.constant 0 : index
    %50 = vector.load %arg2[%c2_54, %c0_55, %c0_56] : memref<5x144x256xbf16, #tpu.memory_space<vmem>>, vector<1x144x256xbf16>
    %51 = vector.shape_cast %50 : vector<1x144x256xbf16> to vector<144x256xbf16>
    %cst_57 = arith.constant dense<0.000000e+00> : vector<16x256xf32>
    %52 = tpu.matmul %49, %51, %cst_57 {dimension_numbers = #tpu.dot_dimension_numbers<[1], [0], [0], [1], [0, 0, 1, 1], [], []>} : vector<16x144xbf16>, vector<144x256xbf16>, vector<16x256xf32> -> vector<16x256xf32>
    %53 = arith.addf %46, %52 : vector<16x256xf32>
    %c0_58 = arith.constant 0 : index
    %c0_59 = arith.constant 0 : index
    %c2_60 = arith.constant 2 : index
    %c0_61 = arith.constant 0 : index
    %54 = vector.load %arg1[%c0_58, %c0_59, %c2_60, %c0_61] : memref<1x2x18x144xf32, #tpu.memory_space<vmem>>, vector<1x1x16x144xf32>
    %55 = vector.shape_cast %54 : vector<1x1x16x144xf32> to vector<16x144xf32>
    %56 = arith.truncf %55 : vector<16x144xf32> to vector<16x144xbf16>
    %c3_62 = arith.constant 3 : index
    %c0_63 = arith.constant 0 : index
    %c0_64 = arith.constant 0 : index
    %57 = vector.load %arg2[%c3_62, %c0_63, %c0_64] : memref<5x144x256xbf16, #tpu.memory_space<vmem>>, vector<1x144x256xbf16>
    %58 = vector.shape_cast %57 : vector<1x144x256xbf16> to vector<144x256xbf16>
    %cst_65 = arith.constant dense<0.000000e+00> : vector<16x256xf32>
    %59 = tpu.matmul %56, %58, %cst_65 {dimension_numbers = #tpu.dot_dimension_numbers<[1], [0], [0], [1], [0, 0, 1, 1], [], []>} : vector<16x144xbf16>, vector<144x256xbf16>, vector<16x256xf32> -> vector<16x256xf32>
    %60 = arith.addf %53, %59 : vector<16x256xf32>
    %c0_66 = arith.constant 0 : index
    %c1_67 = arith.constant 1 : index
    %c2_68 = arith.constant 2 : index
    %c0_69 = arith.constant 0 : index
    %61 = vector.load %arg1[%c0_66, %c1_67, %c2_68, %c0_69] : memref<1x2x18x144xf32, #tpu.memory_space<vmem>>, vector<1x1x16x144xf32>
    %62 = vector.shape_cast %61 : vector<1x1x16x144xf32> to vector<16x144xf32>
    %63 = arith.truncf %62 : vector<16x144xf32> to vector<16x144xbf16>
    %c4_70 = arith.constant 4 : index
    %c0_71 = arith.constant 0 : index
    %c0_72 = arith.constant 0 : index
    %64 = vector.load %arg2[%c4_70, %c0_71, %c0_72] : memref<5x144x256xbf16, #tpu.memory_space<vmem>>, vector<1x144x256xbf16>
    %65 = vector.shape_cast %64 : vector<1x144x256xbf16> to vector<144x256xbf16>
    %cst_73 = arith.constant dense<0.000000e+00> : vector<16x256xf32>
    %66 = tpu.matmul %63, %65, %cst_73 {dimension_numbers = #tpu.dot_dimension_numbers<[1], [0], [0], [1], [0, 0, 1, 1], [], []>} : vector<16x144xbf16>, vector<144x256xbf16>, vector<16x256xf32> -> vector<16x256xf32>
    %67 = arith.addf %60, %66 : vector<16x256xf32>
    %68 = arith.maximumf %33, %67 : vector<16x256xf32>
    %69 = vector.extract_strided_slice %68 {offsets = [0, 0], sizes = [16, 128], strides = [1, 1]} : vector<16x256xf32> to vector<16x128xf32>
    %70 = vector.extract_strided_slice %68 {offsets = [0, 128], sizes = [16, 128], strides = [1, 1]} : vector<16x256xf32> to vector<16x128xf32>
    %71 = arith.maximumf %69, %70 : vector<16x128xf32>
    %c0_74 = arith.constant 0 : index
    %c0_75 = arith.constant 0 : index
    %72 = vector.load %arg3[%c0_74, %c0_75] : memref<1x128xf32, #tpu.memory_space<vmem>>, vector<1x128xf32>
    %73 = vector.broadcast %72 : vector<1x128xf32> to vector<16x128xf32>
    %74 = arith.addf %71, %73 : vector<16x128xf32>
    %cst_76 = arith.constant 0.000000e+00 : f32
    %75 = vector.broadcast %cst_76 : f32 to vector<16x128xf32>
    %76 = arith.maximumf %74, %75 : vector<16x128xf32>
    %c0_77 = arith.constant 0 : index
    %c0_78 = arith.constant 0 : index
    %c0_79 = arith.constant 0 : index
    %77 = vector.load %arg4[%c0_77, %c0_78, %c0_79] : memref<1x16x128xf32, #tpu.memory_space<vmem>>, vector<1x16x128xf32>
    %78 = vector.shape_cast %77 : vector<1x16x128xf32> to vector<16x128xf32>
    %79 = vector.shape_cast %76 : vector<16x128xf32> to vector<1x16x128xf32>
    tpu.vector_store %arg4[%c0_77, %c0_78, %c0_79], %79 {strides = array<i32>} : memref<1x16x128xf32, #tpu.memory_space<vmem>>, vector<1x16x128xf32>,
    return
  }
  func.func @transform_0(%arg0: i32) -> (i32, i32, i32, i32) {
    %c0_i32 = arith.constant 0 : i32
    %c0_i32_0 = arith.constant 0 : i32
    %c0_i32_1 = arith.constant 0 : i32
    %c0_i32_2 = arith.constant 0 : i32
    return %arg0, %c0_i32, %c0_i32_0, %c0_i32_1 : i32, i32, i32, i32
  }
  func.func @transform_1(%arg0: i32) -> (i32, i32, i32) {
    %c0_i32 = arith.constant 0 : i32
    %c0_i32_0 = arith.constant 0 : i32
    %c0_i32_1 = arith.constant 0 : i32
    %c0_i32_2 = arith.constant 0 : i32
    return %c0_i32, %c0_i32_0, %c0_i32_1 : i32, i32, i32
  }
  func.func @transform_2(%arg0: i32) -> (i32, i32) {
    %c0_i32 = arith.constant 0 : i32
    %c0_i32_0 = arith.constant 0 : i32
    %c0_i32_1 = arith.constant 0 : i32
    return %c0_i32, %c0_i32_0 : i32, i32
  }
  func.func @transform_3(%arg0: i32) -> (i32, i32, i32) {
    %c0_i32 = arith.constant 0 : i32
    %c0_i32_0 = arith.constant 0 : i32
    %c0_i32_1 = arith.constant 0 : i32
    return %arg0, %c0_i32, %c0_i32_0 : i32, i32, i32
  }
}

module attributes {stable_mosaic.version = 11 : i64} {
  func.func @kernel_head(%arg0: i32, %arg1: memref<1x2x10x160xf32, #tpu.memory_space<vmem>>, %arg2: memref<5x160x256xbf16, #tpu.memory_space<vmem>>, %arg3: memref<1x128xf32, #tpu.memory_space<vmem>>, %arg4: memref<128x10xf32, #tpu.memory_space<vmem>>, %arg5: memref<1x10xf32, #tpu.memory_space<vmem>>, %arg6: memref<1x1x10xf32, #tpu.memory_space<vmem>>) attributes {dimension_semantics = [#tpu.dimension_semantics<parallel>], iteration_bounds = array<i64: 2>, scalar_prefetch = 0 : i64, scratch_operands = 0 : i64, tpu.core_type = #tpu.core_type<tc>, window_params = [{transform_indices = @transform_0, window_bounds = array<i64: 1, 2, 10, 160>}, {pipeline_mode = #tpu.pipeline_mode<synchronous>, transform_indices = @transform_1, window_bounds = array<i64: 5, 160, 256>}, {pipeline_mode = #tpu.pipeline_mode<synchronous>, transform_indices = @transform_2, window_bounds = array<i64: 1, 128>}, {pipeline_mode = #tpu.pipeline_mode<synchronous>, transform_indices = @transform_3, window_bounds = array<i64: 128, 10>}, {pipeline_mode = #tpu.pipeline_mode<synchronous>, transform_indices = @transform_4, window_bounds = array<i64: 1, 10>}, {transform_indices = @transform_5, window_bounds = array<i64: 1, 1, 10>}]} {
    %c0 = arith.constant 0 : index
    %c0_0 = arith.constant 0 : index
    %c0_1 = arith.constant 0 : index
    %c0_2 = arith.constant 0 : index
    %0 = vector.load %arg1[%c0, %c0_0, %c0_1, %c0_2] : memref<1x2x10x160xf32, #tpu.memory_space<vmem>>, vector<1x1x8x160xf32>
    %1 = vector.shape_cast %0 : vector<1x1x8x160xf32> to vector<8x160xf32>
    %2 = arith.truncf %1 : vector<8x160xf32> to vector<8x160xbf16>
    %c0_3 = arith.constant 0 : index
    %c0_4 = arith.constant 0 : index
    %c0_5 = arith.constant 0 : index
    %3 = vector.load %arg2[%c0_3, %c0_4, %c0_5] : memref<5x160x256xbf16, #tpu.memory_space<vmem>>, vector<1x160x256xbf16>
    %4 = vector.shape_cast %3 : vector<1x160x256xbf16> to vector<160x256xbf16>
    %cst = arith.constant dense<0.000000e+00> : vector<8x256xf32>
    %5 = tpu.matmul %2, %4, %cst {dimension_numbers = #tpu.dot_dimension_numbers<[1], [0], [0], [1], [0, 0, 1, 1], [], []>} : vector<8x160xbf16>, vector<160x256xbf16>, vector<8x256xf32> -> vector<8x256xf32>
    %c0_6 = arith.constant 0 : index
    %c1 = arith.constant 1 : index
    %c0_7 = arith.constant 0 : index
    %c0_8 = arith.constant 0 : index
    %6 = vector.load %arg1[%c0_6, %c1, %c0_7, %c0_8] : memref<1x2x10x160xf32, #tpu.memory_space<vmem>>, vector<1x1x8x160xf32>
    %7 = vector.shape_cast %6 : vector<1x1x8x160xf32> to vector<8x160xf32>
    %8 = arith.truncf %7 : vector<8x160xf32> to vector<8x160xbf16>
    %c1_9 = arith.constant 1 : index
    %c0_10 = arith.constant 0 : index
    %c0_11 = arith.constant 0 : index
    %9 = vector.load %arg2[%c1_9, %c0_10, %c0_11] : memref<5x160x256xbf16, #tpu.memory_space<vmem>>, vector<1x160x256xbf16>
    %10 = vector.shape_cast %9 : vector<1x160x256xbf16> to vector<160x256xbf16>
    %cst_12 = arith.constant dense<0.000000e+00> : vector<8x256xf32>
    %11 = tpu.matmul %8, %10, %cst_12 {dimension_numbers = #tpu.dot_dimension_numbers<[1], [0], [0], [1], [0, 0, 1, 1], [], []>} : vector<8x160xbf16>, vector<160x256xbf16>, vector<8x256xf32> -> vector<8x256xf32>
    %12 = arith.addf %5, %11 : vector<8x256xf32>
    %c0_13 = arith.constant 0 : index
    %c0_14 = arith.constant 0 : index
    %c1_15 = arith.constant 1 : index
    %c0_16 = arith.constant 0 : index
    %13 = vector.load %arg1[%c0_13, %c0_14, %c1_15, %c0_16] : memref<1x2x10x160xf32, #tpu.memory_space<vmem>>, vector<1x1x8x160xf32>
    %14 = vector.shape_cast %13 : vector<1x1x8x160xf32> to vector<8x160xf32>
    %15 = arith.truncf %14 : vector<8x160xf32> to vector<8x160xbf16>
    %c2 = arith.constant 2 : index
    %c0_17 = arith.constant 0 : index
    %c0_18 = arith.constant 0 : index
    %16 = vector.load %arg2[%c2, %c0_17, %c0_18] : memref<5x160x256xbf16, #tpu.memory_space<vmem>>, vector<1x160x256xbf16>
    %17 = vector.shape_cast %16 : vector<1x160x256xbf16> to vector<160x256xbf16>
    %cst_19 = arith.constant dense<0.000000e+00> : vector<8x256xf32>
    %18 = tpu.matmul %15, %17, %cst_19 {dimension_numbers = #tpu.dot_dimension_numbers<[1], [0], [0], [1], [0, 0, 1, 1], [], []>} : vector<8x160xbf16>, vector<160x256xbf16>, vector<8x256xf32> -> vector<8x256xf32>
    %19 = arith.addf %12, %18 : vector<8x256xf32>
    %c0_20 = arith.constant 0 : index
    %c1_21 = arith.constant 1 : index
    %c1_22 = arith.constant 1 : index
    %c0_23 = arith.constant 0 : index
    %20 = vector.load %arg1[%c0_20, %c1_21, %c1_22, %c0_23] : memref<1x2x10x160xf32, #tpu.memory_space<vmem>>, vector<1x1x8x160xf32>
    %21 = vector.shape_cast %20 : vector<1x1x8x160xf32> to vector<8x160xf32>
    %22 = arith.truncf %21 : vector<8x160xf32> to vector<8x160xbf16>
    %c3 = arith.constant 3 : index
    %c0_24 = arith.constant 0 : index
    %c0_25 = arith.constant 0 : index
    %23 = vector.load %arg2[%c3, %c0_24, %c0_25] : memref<5x160x256xbf16, #tpu.memory_space<vmem>>, vector<1x160x256xbf16>
    %24 = vector.shape_cast %23 : vector<1x160x256xbf16> to vector<160x256xbf16>
    %cst_26 = arith.constant dense<0.000000e+00> : vector<8x256xf32>
    %25 = tpu.matmul %22, %24, %cst_26 {dimension_numbers = #tpu.dot_dimension_numbers<[1], [0], [0], [1], [0, 0, 1, 1], [], []>} : vector<8x160xbf16>, vector<160x256xbf16>, vector<8x256xf32> -> vector<8x256xf32>
    %26 = arith.addf %19, %25 : vector<8x256xf32>
    %c0_27 = arith.constant 0 : index
    %c0_28 = arith.constant 0 : index
    %c2_29 = arith.constant 2 : index
    %c0_30 = arith.constant 0 : index
    %27 = vector.load %arg1[%c0_27, %c0_28, %c2_29, %c0_30] : memref<1x2x10x160xf32, #tpu.memory_space<vmem>>, vector<1x1x8x160xf32>
    %28 = vector.shape_cast %27 : vector<1x1x8x160xf32> to vector<8x160xf32>
    %29 = arith.truncf %28 : vector<8x160xf32> to vector<8x160xbf16>
    %c4 = arith.constant 4 : index
    %c0_31 = arith.constant 0 : index
    %c0_32 = arith.constant 0 : index
    %30 = vector.load %arg2[%c4, %c0_31, %c0_32] : memref<5x160x256xbf16, #tpu.memory_space<vmem>>, vector<1x160x256xbf16>
    %31 = vector.shape_cast %30 : vector<1x160x256xbf16> to vector<160x256xbf16>
    %cst_33 = arith.constant dense<0.000000e+00> : vector<8x256xf32>
    %32 = tpu.matmul %29, %31, %cst_33 {dimension_numbers = #tpu.dot_dimension_numbers<[1], [0], [0], [1], [0, 0, 1, 1], [], []>} : vector<8x160xbf16>, vector<160x256xbf16>, vector<8x256xf32> -> vector<8x256xf32>
    %33 = arith.addf %26, %32 : vector<8x256xf32>
    %c0_34 = arith.constant 0 : index
    %c1_35 = arith.constant 1 : index
    %c0_36 = arith.constant 0 : index
    %c0_37 = arith.constant 0 : index
    %34 = vector.load %arg1[%c0_34, %c1_35, %c0_36, %c0_37] : memref<1x2x10x160xf32, #tpu.memory_space<vmem>>, vector<1x1x8x160xf32>
    %35 = vector.shape_cast %34 : vector<1x1x8x160xf32> to vector<8x160xf32>
    %36 = arith.truncf %35 : vector<8x160xf32> to vector<8x160xbf16>
    %c0_38 = arith.constant 0 : index
    %c0_39 = arith.constant 0 : index
    %c0_40 = arith.constant 0 : index
    %37 = vector.load %arg2[%c0_38, %c0_39, %c0_40] : memref<5x160x256xbf16, #tpu.memory_space<vmem>>, vector<1x160x256xbf16>
    %38 = vector.shape_cast %37 : vector<1x160x256xbf16> to vector<160x256xbf16>
    %cst_41 = arith.constant dense<0.000000e+00> : vector<8x256xf32>
    %39 = tpu.matmul %36, %38, %cst_41 {dimension_numbers = #tpu.dot_dimension_numbers<[1], [0], [0], [1], [0, 0, 1, 1], [], []>} : vector<8x160xbf16>, vector<160x256xbf16>, vector<8x256xf32> -> vector<8x256xf32>
    %c0_42 = arith.constant 0 : index
    %c0_43 = arith.constant 0 : index
    %c1_44 = arith.constant 1 : index
    %c0_45 = arith.constant 0 : index
    %40 = vector.load %arg1[%c0_42, %c0_43, %c1_44, %c0_45] : memref<1x2x10x160xf32, #tpu.memory_space<vmem>>, vector<1x1x8x160xf32>
    %41 = vector.shape_cast %40 : vector<1x1x8x160xf32> to vector<8x160xf32>
    %42 = arith.truncf %41 : vector<8x160xf32> to vector<8x160xbf16>
    %c1_46 = arith.constant 1 : index
    %c0_47 = arith.constant 0 : index
    %c0_48 = arith.constant 0 : index
    %43 = vector.load %arg2[%c1_46, %c0_47, %c0_48] : memref<5x160x256xbf16, #tpu.memory_space<vmem>>, vector<1x160x256xbf16>
    %44 = vector.shape_cast %43 : vector<1x160x256xbf16> to vector<160x256xbf16>
    %cst_49 = arith.constant dense<0.000000e+00> : vector<8x256xf32>
    %45 = tpu.matmul %42, %44, %cst_49 {dimension_numbers = #tpu.dot_dimension_numbers<[1], [0], [0], [1], [0, 0, 1, 1], [], []>} : vector<8x160xbf16>, vector<160x256xbf16>, vector<8x256xf32> -> vector<8x256xf32>
    %46 = arith.addf %39, %45 : vector<8x256xf32>
    %c0_50 = arith.constant 0 : index
    %c1_51 = arith.constant 1 : index
    %c1_52 = arith.constant 1 : index
    %c0_53 = arith.constant 0 : index
    %47 = vector.load %arg1[%c0_50, %c1_51, %c1_52, %c0_53] : memref<1x2x10x160xf32, #tpu.memory_space<vmem>>, vector<1x1x8x160xf32>
    %48 = vector.shape_cast %47 : vector<1x1x8x160xf32> to vector<8x160xf32>
    %49 = arith.truncf %48 : vector<8x160xf32> to vector<8x160xbf16>
    %c2_54 = arith.constant 2 : index
    %c0_55 = arith.constant 0 : index
    %c0_56 = arith.constant 0 : index
    %50 = vector.load %arg2[%c2_54, %c0_55, %c0_56] : memref<5x160x256xbf16, #tpu.memory_space<vmem>>, vector<1x160x256xbf16>
    %51 = vector.shape_cast %50 : vector<1x160x256xbf16> to vector<160x256xbf16>
    %cst_57 = arith.constant dense<0.000000e+00> : vector<8x256xf32>
    %52 = tpu.matmul %49, %51, %cst_57 {dimension_numbers = #tpu.dot_dimension_numbers<[1], [0], [0], [1], [0, 0, 1, 1], [], []>} : vector<8x160xbf16>, vector<160x256xbf16>, vector<8x256xf32> -> vector<8x256xf32>
    %53 = arith.addf %46, %52 : vector<8x256xf32>
    %c0_58 = arith.constant 0 : index
    %c0_59 = arith.constant 0 : index
    %c2_60 = arith.constant 2 : index
    %c0_61 = arith.constant 0 : index
    %54 = vector.load %arg1[%c0_58, %c0_59, %c2_60, %c0_61] : memref<1x2x10x160xf32, #tpu.memory_space<vmem>>, vector<1x1x8x160xf32>
    %55 = vector.shape_cast %54 : vector<1x1x8x160xf32> to vector<8x160xf32>
    %56 = arith.truncf %55 : vector<8x160xf32> to vector<8x160xbf16>
    %c3_62 = arith.constant 3 : index
    %c0_63 = arith.constant 0 : index
    %c0_64 = arith.constant 0 : index
    %57 = vector.load %arg2[%c3_62, %c0_63, %c0_64] : memref<5x160x256xbf16, #tpu.memory_space<vmem>>, vector<1x160x256xbf16>
    %58 = vector.shape_cast %57 : vector<1x160x256xbf16> to vector<160x256xbf16>
    %cst_65 = arith.constant dense<0.000000e+00> : vector<8x256xf32>
    %59 = tpu.matmul %56, %58, %cst_65 {dimension_numbers = #tpu.dot_dimension_numbers<[1], [0], [0], [1], [0, 0, 1, 1], [], []>} : vector<8x160xbf16>, vector<160x256xbf16>, vector<8x256xf32> -> vector<8x256xf32>
    %60 = arith.addf %53, %59 : vector<8x256xf32>
    %c0_66 = arith.constant 0 : index
    %c1_67 = arith.constant 1 : index
    %c2_68 = arith.constant 2 : index
    %c0_69 = arith.constant 0 : index
    %61 = vector.load %arg1[%c0_66, %c1_67, %c2_68, %c0_69] : memref<1x2x10x160xf32, #tpu.memory_space<vmem>>, vector<1x1x8x160xf32>
    %62 = vector.shape_cast %61 : vector<1x1x8x160xf32> to vector<8x160xf32>
    %63 = arith.truncf %62 : vector<8x160xf32> to vector<8x160xbf16>
    %c4_70 = arith.constant 4 : index
    %c0_71 = arith.constant 0 : index
    %c0_72 = arith.constant 0 : index
    %64 = vector.load %arg2[%c4_70, %c0_71, %c0_72] : memref<5x160x256xbf16, #tpu.memory_space<vmem>>, vector<1x160x256xbf16>
    %65 = vector.shape_cast %64 : vector<1x160x256xbf16> to vector<160x256xbf16>
    %cst_73 = arith.constant dense<0.000000e+00> : vector<8x256xf32>
    %66 = tpu.matmul %63, %65, %cst_73 {dimension_numbers = #tpu.dot_dimension_numbers<[1], [0], [0], [1], [0, 0, 1, 1], [], []>} : vector<8x160xbf16>, vector<160x256xbf16>, vector<8x256xf32> -> vector<8x256xf32>
    %67 = arith.addf %60, %66 : vector<8x256xf32>
    %68 = arith.maximumf %33, %67 : vector<8x256xf32>
    %69 = vector.extract_strided_slice %68 {offsets = [0, 0], sizes = [8, 128], strides = [1, 1]} : vector<8x256xf32> to vector<8x128xf32>
    %70 = vector.extract_strided_slice %68 {offsets = [0, 128], sizes = [8, 128], strides = [1, 1]} : vector<8x256xf32> to vector<8x128xf32>
    %71 = arith.maximumf %69, %70 : vector<8x128xf32>
    %c0_74 = arith.constant 0 : index
    %c0_75 = arith.constant 0 : index
    %72 = vector.load %arg3[%c0_74, %c0_75] : memref<1x128xf32, #tpu.memory_space<vmem>>, vector<1x128xf32>
    %73 = vector.broadcast %72 : vector<1x128xf32> to vector<8x128xf32>
    %74 = arith.addf %71, %73 : vector<8x128xf32>
    %cst_76 = arith.constant 0.000000e+00 : f32
    %75 = vector.broadcast %cst_76 : f32 to vector<8x128xf32>
    %76 = arith.maximumf %74, %75 : vector<8x128xf32>
    %cst_77 = arith.constant dense<0.000000e+00> : vector<128xf32>
    %77 = vector.multi_reduction <add>, %76, %cst_77 [0] : vector<8x128xf32> to vector<128xf32>
    %78 = vector.shape_cast %77 : vector<128xf32> to vector<1x128xf32>
    %c0_78 = arith.constant 0 : index
    %c0_79 = arith.constant 0 : index
    %79 = vector.load %arg4[%c0_78, %c0_79] : memref<128x10xf32, #tpu.memory_space<vmem>>, vector<128x10xf32>
    %cst_80 = arith.constant dense<0.000000e+00> : vector<1x10xf32>
    %80 = tpu.matmul %78, %79, %cst_80 {dimension_numbers = #tpu.dot_dimension_numbers<[1], [0], [0], [1], [0, 0, 1, 1], [], []>} : vector<1x128xf32>, vector<128x10xf32>, vector<1x10xf32> -> vector<1x10xf32>
    %c0_81 = arith.constant 0 : index
    %c0_82 = arith.constant 0 : index
    %81 = vector.load %arg5[%c0_81, %c0_82] : memref<1x10xf32, #tpu.memory_space<vmem>>, vector<1x10xf32>
    %82 = arith.addf %80, %81 : vector<1x10xf32>
    %c0_83 = arith.constant 0 : index
    %c0_84 = arith.constant 0 : index
    %c0_85 = arith.constant 0 : index
    %83 = vector.load %arg6[%c0_83, %c0_84, %c0_85] : memref<1x1x10xf32, #tpu.memory_space<vmem>>, vector<1x1x10xf32>
    %84 = vector.shape_cast %83 : vector<1x1x10xf32> to vector<1x10xf32>
    %85 = vector.shape_cast %82 : vector<1x10xf32> to vector<1x1x10xf32>
    tpu.vector_store %arg6[%c0_83, %c0_84, %c0_85], %85 {strides = array<i32>} : memref<1x1x10xf32, #tpu.memory_space<vmem>>, vector<1x1x10xf32>,
    return
  }
  func.func @transform_0(%arg0: i32) -> (i32, i32, i32, i32) {
    %c0_i32 = arith.constant 0 : i32
    %c0_i32_0 = arith.constant 0 : i32
    %c0_i32_1 = arith.constant 0 : i32
    %c0_i32_2 = arith.constant 0 : i32
    return %arg0, %c0_i32, %c0_i32_0, %c0_i32_1 : i32, i32, i32, i32
  }
  func.func @transform_1(%arg0: i32) -> (i32, i32, i32) {
    %c0_i32 = arith.constant 0 : i32
    %c0_i32_0 = arith.constant 0 : i32
    %c0_i32_1 = arith.constant 0 : i32
    %c0_i32_2 = arith.constant 0 : i32
    return %c0_i32, %c0_i32_0, %c0_i32_1 : i32, i32, i32
  }
  func.func @transform_2(%arg0: i32) -> (i32, i32) {
    %c0_i32 = arith.constant 0 : i32
    %c0_i32_0 = arith.constant 0 : i32
    %c0_i32_1 = arith.constant 0 : i32
    return %c0_i32, %c0_i32_0 : i32, i32
  }
  func.func @transform_3(%arg0: i32) -> (i32, i32) {
    %c0_i32 = arith.constant 0 : i32
    %c0_i32_0 = arith.constant 0 : i32
    %c0_i32_1 = arith.constant 0 : i32
    return %c0_i32, %c0_i32_0 : i32, i32
  }
  func.func @transform_4(%arg0: i32) -> (i32, i32) {
    %c0_i32 = arith.constant 0 : i32
    %c0_i32_0 = arith.constant 0 : i32
    %c0_i32_1 = arith.constant 0 : i32
    return %c0_i32, %c0_i32_0 : i32, i32
  }
  func.func @transform_5(%arg0: i32) -> (i32, i32, i32) {
    %c0_i32 = arith.constant 0 : i32
    %c0_i32_0 = arith.constant 0 : i32
    %c0_i32_1 = arith.constant 0 : i32
    return %arg0, %c0_i32, %c0_i32_0 : i32, i32, i32
  }
}

</mosaic_0001>

<bundles_post_ra>
// kernel: convnet_forward.2
= control target key start
LH: loop header
LB: loop body
LE: loop exit
PB: predicated region body
PF: predicated region fallthrough
CT: control target
= control target key end

     0   :  { %s1756_s12 = smov 0   ;;  %s2516_s0 = inlined_call_operand.vmem [shape: f32[2,2,18,144], index: 0, kind: input, shape index: {}]   ;;  %s2517_s1 = inlined_call_operand.vmem [shape: bf16[5,144,256], index: 1, kind: input, shape index: {}]   ;;  %s2518_s2 = inlined_call_operand.vmem [shape: f32[1,128], index: 2, kind: input, shape index: {}]   ;;  %s2519_s3 = inlined_call_operand.vmem [shape: f32[2,16,128], index: 3, kind: output, shape index: {}]  }
   0x1 LB: > { %s1386_s13 = sadd.s32 4294967295, %s1734_s12   ;;  %p1390_p0 = scmp.ge.s32.totalorder %s1734_s12, 1  ;;  %s1734_s12 = sphi %s1756_s12, %s13_s12  }
   0x2   : > { %p137_p1 = scmp.lt.s32.totalorder %s1734_s12, 3 }
   0x4   : > { %p138_p2 = pnand %p1390_p0, %p137_p1 }
   0x6   : > { %141 = sbr.rel (%p138_p2) target bundleno = 404 (0x194), region = 32 }
   0xb   : > { %v1767_v0 = vld [vmem:[%s2517_s1 + $0x104] ss:$8 sps:$4 sm:$0xff]   ;;  %v1772_v1 = vld [vmem:[%s2517_s1 + $0x74] ss:$8 sps:$4 sm:$0xff]   ;;  %v1778_v2 = vld [vmem:[%s2517_s1 + $0x100] ss:$8 sps:$4 sm:$0xff]  }
   0xc   : > { %316 = vmatprep.subr.bf16.mxu0 %v1767_v0  ;;  %v1783_v3 = vld [vmem:[%s2517_s1 + $0x70] ss:$8 sps:$4 sm:$0xff]   ;;  %452 = vmatprep.subr.bf16.mxu1 %v1772_v1  ;;  %v1789_v4 = vld [vmem:[%s2517_s1 + $0xf4] ss:$8 sps:$4 sm:$0xff]   ;;  %v1796_v5 = vld [vmem:[%s2517_s1 + $0x64] ss:$8 sps:$4 sm:$0xff]  }
   0xd   : > { %317 = vmatpush1.bf16.msra.mxu0 %v1778_v2  ;;  %453 = vmatpush1.bf16.msra.mxu1 %v1783_v3  ;;  %v1801_v6 = vld [vmem:[%s2517_s1 + $0xf0] ss:$8 sps:$4 sm:$0xff]   ;;  %v1807_v7 = vld [vmem:[%s2517_s1 + $0x60] ss:$8 sps:$4 sm:$0xff]   ;;  %v1813_v8 = vld [vmem:[%s2517_s1 + $0xe4] ss:$8 sps:$4 sm:$0xff]  }
   0xe   : > { %318 = vmatprep.subr.bf16.mxu0 %v1789_v4  ;;  %454 = vmatprep.subr.bf16.mxu1 %v1796_v5  ;;  %v1818_v9 = vld [vmem:[%s2517_s1 + $0x54] ss:$8 sps:$4 sm:$0xff]   ;;  %v1823_v10 = vld [vmem:[%s2517_s1 + $0xe0] ss:$8 sps:$4 sm:$0xff]   ;;  %v1828_v11 = vld [vmem:[%s2517_s1 + $0x50] ss:$8 sps:$4 sm:$0xff]  }
   0xf   : > { %v1835_v12 = vld [vmem:[%s2517_s1 + $0xd4] ss:$8 sps:$4 sm:$0xff]   ;;  %v1842_v13 = vld [vmem:[%s2517_s1 + $0x44] ss:$8 sps:$4 sm:$0xff]   ;;  %p161_p3 = scmp.lt.s32.totalorder %s1386_s13, 1  ;;  %vm312_vm0 = vcmask 130048  }
  0x10   : > { %v1849_v14 = vld [vmem:[%s2517_s1 + $0xd0] ss:$8 sps:$4 sm:$0xff]   ;;  %v1856_v15 = vld [vmem:[%s2517_s1 + $0x40] ss:$8 sps:$4 sm:$0xff]   ;;  %v1861_v16 = vld [vmem:[%s2517_s1 + $0xc4] ss:$8 sps:$4 sm:$0xff]  }
  0x11   : > { %319 = vmatpush1.bf16.msra.mxu0 %v1801_v6  ;;  %455 = vmatpush1.bf16.msra.mxu1 %v1807_v7  ;;  %v1868_v17 = vld [vmem:[%s2517_s1 + $0x34] ss:$8 sps:$4 sm:$0xff]   ;;  %s2635_s13 = smov (!%p161_p3, %s1386_s13), 1  ;;  %v1877_v18 = vld [vmem:[%s2517_s1 + $0xc0] ss:$8 sps:$4 sm:$0xff]   ;;  %vm915_vm2 = vcmask 1046528  }
  0x12   : > { %320 = vmatprep.subr.bf16.mxu0 %v1813_v8  ;;  %456 = vmatprep.subr.bf16.mxu1 %v1818_v9  ;;  %2558 = vst [vmem:[#allocation2_spill] sm:$0xff] %v1868_v17  ;;  %v1882_v19 = vld [vmem:[%s2517_s1 + $0x30] ss:$8 sps:$4 sm:$0xff]   ;;  %v1889_v20 = vld [vmem:[%s2517_s1 + $0xb4] ss:$8 sps:$4 sm:$0xff]   ;;  %s1584_s6 = smul.u32 96, %s2635_s13 }
  0x13   : > { %2559 = vst [vmem:[#allocation3_spill] sm:$0xff] %v1882_v19  ;;  %v1896_v21 = vld [vmem:[%s2517_s1 + $0x24] ss:$8 sps:$4 sm:$0xff]   ;;  %v1902_v22 = vld [vmem:[%s2517_s1 + $0xb0] ss:$8 sps:$4 sm:$0xff]   ;;  %s1583_s28 = sshll.u32 %s2635_s13, 4 }
  0x14   : > { %2560 = vst [vmem:[#allocation4_spill] sm:$0xff] %v1896_v21  ;;  %v1909_v23 = vld [vmem:[%s2517_s1 + $0x20] ss:$8 sps:$4 sm:$0xff]   ;;  %v1914_v24 = vld [vmem:[%s2517_s1 + $0xa4] ss:$8 sps:$4 sm:$0xff]   ;;  %s1926_s19 = scalar_lea.vmem %s2516_s0, %s1584_s6  ;;  %s170_s4 = scalar_lea.vmem %s2519_s3, %s1583_s28 }
  0x15   : > { %321 = vmatpush1.bf16.msra.mxu0 %v1823_v10  ;;  %457 = vmatpush1.bf16.msra.mxu1 %v1828_v11  ;;  %2561 = vst [vmem:[#allocation5_spill] sm:$0xff] %v1909_v23  ;;  %v1921_v25 = vld [vmem:[%s2517_s1 + $0x14] ss:$8 sps:$4 sm:$0xff]   ;;  %v1931_v26 = vld [vmem:[%s2517_s1 + $0xa0] ss:$8 sps:$4 sm:$0xff]  }
  0x16   : > { %322 = vmatprep.subr.bf16.mxu0 %v1835_v12  ;;  %458 = vmatprep.subr.bf16.mxu1 %v1842_v13  ;;  %2562 = vst [vmem:[#allocation6_spill] sm:$0xff] %v1921_v25  ;;  %v1936_v27 = vld [vmem:[%s2517_s1 + $0x10] ss:$8 sps:$4 sm:$0xff]   ;;  %v1942_v29 = vld [vmem:[%s1926_s19 + $0x48] sm:$0xff]  ;;  %v1950_v31 = vld [vmem:[%s2517_s1 + $0x94] ss:$8 sps:$4 sm:$0xff]  }
  0x17   : > { %2563 = vst [vmem:[#allocation7_spill] sm:$0xff] %v1936_v27  ;;  %v1395_v28 = vld [vmem:[%s1926_s19 + $0x38] sm:$0xff]  ;;  %v173_v30 = vld [vmem:[%s1926_s19 + $0x8] sm:$0xff]  ;;  %v1394_v42 = vld [vmem:[%s1926_s19 + $0x30] sm:$0xff]  ;;  %vm524_vm1 = vsmask.f32 7424 }
  0x18   : > { %v1955_v32 = vld [vmem:[%s2517_s1 + $0x4] ss:$8 sps:$4 sm:$0xff]   ;;  %v1958_v33 = vpack.c.bf16 %v1942_v29, %v1395_v28  ;;  %v1961_v34 = vld [vmem:[%s1926_s19 + $0x18] sm:$0xff]  ;;  %v1972_v37 = vld [vmem:[%s2517_s1] ss:$8 sps:$4 sm:$0xff]  }
  0x19   : > { %323 = vmatpush1.bf16.msra.mxu0 %v1849_v14  ;;  %459 = vmatpush1.bf16.msra.mxu1 %v1856_v15  ;;  %2564 = vst [vmem:[#allocation8_spill] sm:$0xff] %v1955_v32  ;;  %v177_v35 = vpack.c.bf16 %v1961_v34, %v173_v30  ;;  %v1967_v36 = vld [vmem:[%s2517_s1 + $0x90] ss:$8 sps:$4 sm:$0xff]   ;;  %2565 = vst [vmem:[#allocation9_spill] sm:$0xff] %v1972_v37  ;;  %v1981_v38 = vld [vmem:[%s2517_s1 + $0x114] ss:$8 sps:$4 sm:$0xff]  }
  0x1a   : > { %324 = vmatprep.subr.bf16.mxu0 %v1861_v16  ;;  %460 = vmatprep.subr.bf16.mxu1 %v1868_v17  ;;  %v1988_v39 = vld [vmem:[%s2517_s1 + $0x84] ss:$8 sps:$4 sm:$0xff]   ;;  %v1993_v40 = vld [vmem:[%s2517_s1 + $0x110] ss:$8 sps:$4 sm:$0xff]   ;;  %v1998_v41 = vld [vmem:[%s2517_s1 + $0x80] ss:$8 sps:$4 sm:$0xff]  }
  0x1b   : > { %1434 = vmatprep.mubr.msk.bf16.mxu0 %vm312_vm0, %v1958_v33  ;;  %2566 = vst [vmem:[#allocation10_spill] sm:$0xff] %v1988_v39  ;;  %2567 = vst [vmem:[#allocation11_spill] sm:$0xff] %v1998_v41  ;;  %1453 = vmatprep.mubr.msk.bf16.mxu1 %vm312_vm0, %v177_v35  ;;  %v2003_v43 = vld [vmem:[%s1926_s19 + $0x40] sm:$0xff]  ;;  %v2007_v45 = vld [vmem:[%s1926_s19 + $0x10] sm:$0xff] }
  0x1c   : > { %v172_v44 = vld [vmem:[%s1926_s19] sm:$0xff]  ;;  %v2014_v46 = vld [vmem:[%s2517_s1 + $0x194] ss:$8 sps:$4 sm:$0xff]   ;;  %v2024_v48 = vpack.c.bf16 %v2003_v43, %v1394_v42  ;;  %v2030_v50 = vld [vmem:[%s2517_s1 + $0x190] ss:$8 sps:$4 sm:$0xff]  }
  0x1d   : > { %325 = vmatpush1.bf16.msra.mxu0 %v1877_v18  ;;  %461 = vmatpush1.bf16.msra.mxu1 %v1882_v19  ;;  %v2021_v47 = vld [vmem:[%s2517_s1 + $0x224] ss:$8 sps:$4 sm:$0xff]   ;;  %v176_v49 = vpack.c.bf16 %v2007_v45, %v172_v44  ;;  %v2035_v51 = vld [vmem:[%s2517_s1 + $0x220] ss:$8 sps:$4 sm:$0xff]   ;;  %v2049_v53 = vld [vmem:[%s2517_s1 + $0x214] ss:$8 sps:$4 sm:$0xff]  }
  0x1e   : > { %326 = vmatprep.subr.bf16.mxu0 %v1889_v20  ;;  %462 = vmatprep.subr.bf16.mxu1 %v1896_v21  ;;  %2568 = vst [vmem:[#allocation12_spill] sm:$0xff] %v2021_v47  ;;  %2569 = vst [vmem:[#allocation13_spill] sm:$0xff] %v2024_v48  ;;  %v2042_v52 = vld [vmem:[%s2517_s1 + $0x184] ss:$8 sps:$4 sm:$0xff]   ;;  %v2055_v54 = vld [vmem:[%s2517_s1 + $0x180] ss:$8 sps:$4 sm:$0xff]  }
  0x1f   : > { %2570 = vst [vmem:[#allocation14_spill] sm:$0xff] %v2035_v51  ;;  %2571 = vst [vmem:[#allocation15_spill] sm:$0xff] %v2049_v53  ;;  %v2060_v55 = vld [vmem:[%s2517_s1 + $0x210] ss:$8 sps:$4 sm:$0xff]   ;;  %v2067_v56 = vld [vmem:[%s2517_s1 + $0x174] ss:$8 sps:$4 sm:$0xff]  }
  0x20   : > { %2572 = vst [vmem:[#allocation16_spill] sm:$0xff] %v2060_v55  ;;  %v2074_v57 = vld [vmem:[%s2517_s1 + $0x204] ss:$8 sps:$4 sm:$0xff]   ;;  %v2079_v58 = vld [vmem:[%s2517_s1 + $0x170] ss:$8 sps:$4 sm:$0xff]  }
  0x21   : > { %327 = vmatpush1.bf16.msra.mxu0 %v1902_v22  ;;  %463 = vmatpush1.bf16.msra.mxu1 %v1909_v23  ;;  %2573 = vst [vmem:[#allocation17_spill] sm:$0xff] %v2074_v57  ;;  %v2084_v59 = vld [vmem:[%s2517_s1 + $0x200] ss:$8 sps:$4 sm:$0xff]   ;;  %v2091_v60 = vld [vmem:[%s2517_s1 + $0x164] ss:$8 sps:$4 sm:$0xff]  }
  0x22   : > { %328 = vmatprep.subr.bf16.mxu0 %v1914_v24  ;;  %464 = vmatprep.subr.bf16.mxu1 %v1921_v25  ;;  %2574 = vst [vmem:[#allocation18_spill] sm:$0xff] %v2084_v59  ;;  %v2098_v61 = vld [vmem:[%s2517_s1 + $0x1f4] ss:$8 sps:$4 sm:$0xff]   ;;  %v2103_v62 = vld [vmem:[%s2517_s1 + $0x160] ss:$8 sps:$4 sm:$0xff]  }
  0x23   : > { %2575 = vst [vmem:[#allocation19_spill] sm:$0xff] %v2098_v61  ;;  %2576 = vst [vmem:[#allocation20_spill] sm:$0xff] %v2103_v62  ;;  %v2108_v63 = vld [vmem:[%s2517_s1 + $0x1f0] ss:$8 sps:$4 sm:$0xff]   ;;  %v2115_v28 = vld [vmem:[%s2517_s1 + $0x154] ss:$8 sps:$4 sm:$0xff]  }
  0x24   : > { %2577 = vst [vmem:[#allocation21_spill] sm:$0xff] %v2108_v63  ;;  %2578 = vst [vmem:[#allocation22_spill] sm:$0xff] %v2115_v28  ;;  %v2122_v30 = vld [vmem:[%s2517_s1 + $0x1e4] ss:$8 sps:$4 sm:$0xff]   ;;  %v2127_v35 = vld [vmem:[%s2517_s1 + $0x150] ss:$8 sps:$4 sm:$0xff]  }
  0x25   : > { %329 = vmatpush1.bf16.msra.mxu0 %v1931_v26  ;;  %465 = vmatpush1.bf16.msra.mxu1 %v1936_v27  ;;  %2579 = vst [vmem:[#allocation23_spill] sm:$0xff] %v2122_v30  ;;  %2580 = vst [vmem:[#allocation24_spill] sm:$0xff] %v2127_v35  ;;  %v2132_v42 = vld [vmem:[%s2517_s1 + $0x1e0] ss:$8 sps:$4 sm:$0xff]  }
  0x26   : > { %330 = vmatprep.subr.bf16.mxu0 %v1950_v31  ;;  %466 = vmatprep.subr.bf16.mxu1 %v1955_v32  ;;  %2581 = vst [vmem:[#allocation25_spill] sm:$0xff] %v2132_v42  ;;  %v496_v44 = vld [vmem:[%s1926_s19 + $0x8] sm:$0xfe]  ;;  %v499_v23 = vld [vmem:[%s1926_s19 + $0x20] sm:$0x1] }
  0x29   : > { %331 = vmatpush1.bf16.msra.mxu0 %v1967_v36  ;;  %467 = vmatpush1.bf16.msra.mxu1 %v1972_v37  ;;  %v2159_v37 = vld [vmem:[%s2517_s1 + $0x140] ss:$8 sps:$4 sm:$0xff]  }
  0x2a   : > { %346 = vmatprep.subr.bf16.mxu0 %v1981_v38  ;;  %482 = vmatprep.subr.bf16.mxu1 %v1988_v39  ;;  %v1491_v39 = vld [vmem:[%s1926_s19 + $0x30] sm:$0xfe]  ;;  %2584 = vst [vmem:[#allocation28_spill] sm:$0xff] %v2159_v37 }
  0x2b   : > { %v696_v17 = vpack.c.bf16 %v2003_v43, %v1491_v39  ;;  %v2187_v39 = vld [vmem:[%s2517_s1 + $0x130] ss:$8 sps:$4 sm:$0xff]  }
  0x2c   : > { %2588 = vst [vmem:[#allocation32_spill] sm:$0xff] %v2187_v39 }
  0x2d   : > { %347 = vmatpush2.bf16.msra.mxu0 %v1993_v40  ;;  %483 = vmatpush2.bf16.msra.mxu1 %v1998_v41 }
  0x2e   : > { %643 = vmatprep.subr.bf16.mxu0 %v2014_v46  ;;  %837 = vmatprep.subr.bf16.mxu1 %v2021_v47  ;;  %v495_v47 = vld [vmem:[%s1926_s19] sm:$0xfe] }
  0x30   : > { %349 = vmatmul.mubr.bf16.vlgmr.msra.gmra.mxu0 %v2024_v48  ;;  %485 = vmatmul.mubr.bf16.vlgmr.msra.gmra.mxu1 %v176_v49  ;;  %v500_v49 = vld [vmem:[%s1926_s19 + $0x28] sm:$0x1] }
  0x31   : > { %644 = vmatpush1.bf16.msra.mxu0 %v2030_v50  ;;  %838 = vmatpush1.bf16.msra.mxu1 %v2035_v51  ;;  %v504_v51 = vpack.c.bf16 %v500_v49, %v500_v49  ;;  %v2164_v49 = vld [vmem:[%s2517_s1 + $0x1d0] ss:$8 sps:$4 sm:$0xff]  }
  0x32   : > { %645 = vmatprep.subr.bf16.mxu0 %v2042_v52  ;;  %839 = vmatprep.subr.bf16.mxu1 %v2049_v53  ;;  %v2149_v53 = vld [vmem:[%s2517_s1 + $0x1d4] ss:$8 sps:$4 sm:$0xff]   ;;  %2585 = vst [vmem:[#allocation29_spill] sm:$0xff] %v2164_v49 }
  0x33   : > { %2583 = vst [vmem:[#allocation27_spill] sm:$0xff] %v2149_v53 }
  0x35   : > { %646 = vmatpush1.bf16.msra.mxu0 %v2055_v54  ;;  %840 = vmatpush1.bf16.msra.mxu1 %v2060_v55  ;;  %v2144_v55 = vld [vmem:[%s2517_s1 + $0x144] ss:$8 sps:$4 sm:$0xff]  }
  0x36   : > { %647 = vmatprep.subr.bf16.mxu0 %v2067_v56  ;;  %841 = vmatprep.subr.bf16.mxu1 %v2074_v57  ;;  %v1496_v57 = vld [vmem:[%s1926_s19 + $0x58] sm:$0x1]  ;;  %2582 = vst [vmem:[#allocation26_spill] sm:$0xff] %v2144_v55 }
  0x37   : > { %v699_v48 = vpack.c.bf16 %v1496_v57, %v1496_v57  ;;  %v545_v57 = vshll.u32 %v504_v51, 16 }
  0x39   : > { %648 = vmatpush1.bf16.msra.mxu0 %v2079_v58  ;;  %842 = vmatpush1.bf16.msra.mxu1 %v2084_v59  ;;  %v1492_v59 = vld [vmem:[%s1926_s19 + $0x38] sm:$0xfe]  ;;  %v739_v27 = vshll.u32 %v699_v48, 16  ;;  %v547_v21 = vrot.slane %v545_v57, 1 }
  0x3a   : > { %649 = vmatprep.subr.bf16.mxu0 %v2091_v60  ;;  %843 = vmatprep.subr.bf16.mxu1 %v2098_v61  ;;  %v502_v61 = vpack.c.bf16 %v1961_v34, %v496_v44  ;;  %v697_v44 = vpack.c.bf16 %v1942_v29, %v1492_v59 }
  0x3c   : > { %v540_v41 = vshll.u32 %v502_v61, 16  ;;  %v732_v59 = vshrl.u32 %v697_v44, 16  ;;  %v734_v32 = vshll.u32 %v697_v44, 16 }
  0x3d   : > { %650 = vmatpush1.bf16.msra.mxu0 %v2103_v62  ;;  %844 = vmatpush1.bf16.msra.mxu1 %v2108_v63  ;;  %v538_v63 = vshrl.u32 %v502_v61, 16  ;;  %v1495_v61 = vld [vmem:[%s1926_s19 + $0x50] sm:$0x1] }
  0x3e   : > { %651 = vmatprep.subr.bf16.mxu0 %v2115_v28  ;;  %845 = vmatprep.subr.bf16.mxu1 %v2122_v30  ;;  %v542_v25 = vrot.slane %v540_v41, 1  ;;  %v501_v30 = vpack.c.bf16 %v2007_v45, %v495_v47  ;;  %v736_v19 = vrot.slane %v734_v32, 1  ;;  %v741_v28 = vrot.slane %v739_v27, 1  ;;  %v2177_v41 = vld [vmem:[%s2517_s1 + $0x134] ss:$8 sps:$4 sm:$0xff]  }
  0x3f   : > { %2586 = vst [vmem:[#allocation30_spill] sm:$0xff] %v2177_v41  ;;  %v2182_v47 = vld [vmem:[%s2517_s1 + $0x1c4] ss:$8 sps:$4 sm:$0xff]   ;;  %v503_v32 = vpack.c.bf16 %v499_v23, %v499_v23  ;;  %v698_v27 = vpack.c.bf16 %v1495_v61, %v1495_v61 }
  0x40   : > { %2587 = vst [vmem:[#allocation31_spill] sm:$0xff] %v2182_v47  ;;  %v543_v48 = vor.u32 %v542_v25, %v538_v63  ;;  %v737_v51 = vor.u32 %v736_v19, %v732_v59  ;;  %v528_v57 = vshll.u32 %v501_v30, 16  ;;  %v2197_v19 = vld [vmem:[%s2517_s1 + $0x1c0] ss:$8 sps:$4 sm:$0xff]   ;;  %v2212_v25 = vld [vmem:[%s2517_s1 + $0x1b4] ss:$8 sps:$4 sm:$0xff]  }
  0x41   : > { %652 = vmatpush1.bf16.msra.mxu0 %v2127_v35  ;;  %846 = vmatpush1.bf16.msra.mxu1 %v2132_v42  ;;  %2589 = vst [vmem:[#allocation33_spill] sm:$0xff] %v2197_v19  ;;  %2591 = vst [vmem:[#allocation35_spill] sm:$0xff] %v2212_v25  ;;  %v2217_v63 = vld [vmem:[%s2517_s1 + $0x120] ss:$8 sps:$4 sm:$0xff]   ;;  %v727_v59 = vshll.u32 %v698_v27, 16  ;;  %v526_v61 = vshrl.u32 %v501_v30, 16 }
  0x42   : > { %653 = vmatprep.subr.bf16.mxu0 %v2144_v55  ;;  %847 = vmatprep.subr.bf16.mxu1 %v2149_v53  ;;  %v2190_v44 = vsel %vm524_vm1, %v543_v48, %v547_v21  ;;  %v722_v53 = vshll.u32 %v696_v17, 16  ;;  %v2200_v23 = vsel %vm524_vm1, %v737_v51, %v741_v28  ;;  %v2207_v21 = vld [vmem:[%s2517_s1 + $0x124] ss:$8 sps:$4 sm:$0xff]   ;;  %2592 = vst [vmem:[#allocation36_spill] sm:$0xff] %v2217_v63  ;;  %v533_v28 = vshll.u32 %v503_v32, 16 }
  0x43   : > { %2590 = vst [vmem:[#allocation34_spill] sm:$0xff] %v2207_v21  ;;  %1490 = vmatprep.mubr.msk.bf16.mxu0 %vm312_vm0, %v2190_v44  ;;  %1533 = vmatprep.mubr.msk.bf16.mxu1 %vm312_vm0, %v2200_v23  ;;  %v530_v48 = vrot.slane %v528_v57, 1  ;;  %v720_v51 = vshrl.u32 %v696_v17, 16  ;;  %v2235_v17 = vld [vmem:[%s2517_s1 + $0x1a4] ss:$8 sps:$4 sm:$0xff]   ;;  %v729_v57 = vrot.slane %v727_v59, 1 }
  0x44   : > { %2594 = vst [vmem:[#allocation38_spill] sm:$0xff] %v2235_v17  ;;  %v2245_v30 = vld [vmem:[%s2517_s1 + $0x1a0] ss:$8 sps:$4 sm:$0xff]   ;;  %v2250_v32 = vld [vmem:[%s2517_s1 + $0x230] ss:$8 sps:$4 sm:$0xff]   ;;  %v535_v27 = vrot.slane %v533_v28, 1 }
  0x45   : > { %654 = vmatpush1.bf16.msra.mxu0 %v2159_v37  ;;  %848 = vmatpush1.bf16.msra.mxu1 %v2164_v49  ;;  %v2228_v49 = vld [vmem:[%s2517_s1 + $0x1b0] ss:$8 sps:$4 sm:$0xff]   ;;  %v885_v42 = vld [vmem:[%s1926_s19 + $0x8] sm:$0xfc]  ;;  %v886_v55 = vld [vmem:[%s1926_s19 + $0x20] sm:$0x3] }
  0x46   : > { %655 = vmatprep.subr.bf16.mxu0 %v2177_v41  ;;  %849 = vmatprep.subr.bf16.mxu1 %v2182_v47  ;;  %v724_v47 = vrot.slane %v722_v53, 1  ;;  %2593 = vst [vmem:[#allocation37_spill] sm:$0xff] %v2228_v49  ;;  %v2240_v53 = vld [vmem:[%s2517_s1 + $0x234] ss:$8 sps:$4 sm:$0xff]   ;;  %v889_v41 = vpack.c.bf16 %v1961_v34, %v885_v42  ;;  %v1578_v59 = vld [vmem:[%s1926_s19 + $0x58] sm:$0x3] }
  0x47   : > { %2595 = vst [vmem:[#allocation39_spill] sm:$0xff] %v2240_v53  ;;  %v1576_v28 = vld [vmem:[%s1926_s19 + $0x38] sm:$0xfc]  ;;  %v1575_v34 = vld [vmem:[%s1926_s19 + $0x30] sm:$0xfc] }
  0x48   : > { %v1577_v42 = vld [vmem:[%s1926_s19 + $0x50] sm:$0x3] }
  0x49   : > { %656 = vmatpush1.bf16.msra.mxu0 %v2187_v39  ;;  %850 = vmatpush1.bf16.msra.mxu1 %v2197_v19  ;;  %v725_v19 = vor.u32 %v724_v47, %v720_v51  ;;  %v884_v39 = vld [vmem:[%s1926_s19] sm:$0xfc]  ;;  %v2267_v47 = vld [vmem:[%s2517_s1 + $0x2b4] ss:$8 sps:$4 sm:$0xff]   ;;  %v1250_v51 = vpack.c.bf16 %v1578_v59, %v1578_v59 }
  0x4a   : > { %657 = vmatprep.subr.bf16.mxu0 %v2207_v21  ;;  %851 = vmatprep.subr.bf16.mxu1 %v2212_v25  ;;  %v531_v25 = vor.u32 %v530_v48, %v526_v61  ;;  %v887_v21 = vld [vmem:[%s1926_s19 + $0x28] sm:$0x3]  ;;  %v888_v35 = vpack.c.bf16 %v2007_v45, %v884_v39  ;;  %v890_v61 = vpack.c.bf16 %v886_v55, %v886_v55  ;;  %v2624_v59 = vld [vmem:[#allocation21_spill] sm:$0xff] }
  0x4b   : > { %v891_v37 = vpack.c.bf16 %v887_v21, %v887_v21  ;;  %v1248_v48 = vpack.c.bf16 %v1942_v29, %v1576_v28  ;;  %v919_v21 = vrot.slane %v889_v41, 1  ;;  %v1247_v39 = vpack.c.bf16 %v2003_v43, %v1575_v34  ;;  %v2623_v28 = vld [vmem:[#allocation19_spill] sm:$0xff] }
  0x4c   : > { %v916_v45 = vrot.slane %v888_v35, 1  ;;  %v1259_v62 = vrot.slane %v1250_v51, 1  ;;  %v2276_v55 = vsel %vm524_vm1, %v531_v25, %v535_v27  ;;  %v2279_v29 = vsel %vm524_vm1, %v725_v19, %v729_v57  ;;  %v2291_v35 = vld [vmem:[%s2517_s1 + $0x2a4] ss:$8 sps:$4 sm:$0xff]   ;;  %v2628_v51 = vld [vmem:[#allocation29_spill] sm:$0xff] }
  0x4d   : > { %658 = vmatpush1.bf16.msra.mxu0 %v2217_v63  ;;  %852 = vmatpush1.bf16.msra.mxu1 %v2228_v49  ;;  %v920_v49 = vrot.slane %v891_v37, 1  ;;  %v917_v63 = vrot.slane %v890_v61, 1  ;;  %v2284_v37 = vld [vmem:[%s2517_s1 + $0x2b0] ss:$8 sps:$4 sm:$0xff]   ;;  %v1255_v43 = vrot.slane %v1247_v39, 1  ;;  %v2622_v57 = vld [vmem:[#allocation18_spill] sm:$0xff] }
  0x4e   : > { %673 = vmatprep.subr.bf16.mxu0 %v2235_v17  ;;  %867 = vmatprep.subr.bf16.mxu1 %v2240_v53  ;;  %v1258_v17 = vrot.slane %v1248_v48, 1  ;;  %v1249_v53 = vpack.c.bf16 %v1577_v42, %v1577_v42  ;;  %v2626_v61 = vld [vmem:[#allocation25_spill] sm:$0xff]  ;;  %v2627_v48 = vld [vmem:[#allocation27_spill] sm:$0xff] }
  0x4f   : > { %v2294_v41 = vsel %vm915_vm2, %v916_v45, %v917_v63  ;;  %v2302_v27 = vsel %vm915_vm2, %v919_v21, %v920_v49  ;;  %v2319_v49 = vld [vmem:[%s2517_s1 + $0x294] ss:$8 sps:$4 sm:$0xff]   ;;  %v2618_v63 = vld [vmem:[#allocation14_spill] sm:$0xff]  ;;  %v2629_v34 = vld [vmem:[#allocation31_spill] sm:$0xff] }
  0x50   : > { %v2297_v19 = vsel %vm915_vm2, %v1258_v17, %v1259_v62  ;;  %v1256_v25 = vrot.slane %v1249_v53, 1  ;;  %v2312_v62 = vld [vmem:[%s2517_s1 + $0x2a0] ss:$8 sps:$4 sm:$0xff]   ;;  %v2620_v53 = vld [vmem:[#allocation16_spill] sm:$0xff]  ;;  %v2630_v42 = vld [vmem:[#allocation33_spill] sm:$0xff] }
  0x51   : > { %674 = vmatpush2.bf16.msra.mxu0 %v2245_v30  ;;  %868 = vmatpush2.bf16.msra.mxu1 %v2250_v32  ;;  %v2619_v17 = vld [vmem:[#allocation15_spill] sm:$0xff]  ;;  %v2632_v45 = vld [vmem:[#allocation37_spill] sm:$0xff] }
  0x52   : > { %1016 = vmatprep.subr.bf16.mxu0 %v2267_v47  ;;  %1063 = vmatprep.subr.bf16.mxu1 %v1767_v0  ;;  %v2305_v0 = vsel %vm915_vm2, %v1255_v43, %v1256_v25  ;;  %v2631_v21 = vld [vmem:[#allocation35_spill] sm:$0xff] }
  0x53   : > { %v2633_v39 = vld [vmem:[#allocation39_spill] sm:$0xff] }
  0x54   : > { %676 = vmatmul.mubr.bf16.vlgmr.msra.gmra.mxu0 %v2276_v55  ;;  %870 = vmatmul.mubr.bf16.vlgmr.msra.gmra.mxu1 %v2279_v29 }
  0x55   : > { %1017 = vmatpush1.bf16.msra.mxu0 %v2284_v37  ;;  %1064 = vmatpush1.bf16.msra.mxu1 %v1778_v2  ;;  %v2330_v2 = vld [vmem:[%s2517_s1 + $0x290] ss:$8 sps:$4 sm:$0xff]  }
  0x56   : > { %1018 = vmatprep.subr.bf16.mxu0 %v2291_v35  ;;  %1065 = vmatprep.subr.bf16.mxu1 %v1789_v4  ;;  %v2337_v4 = vld [vmem:[%s2517_s1 + $0x284] ss:$8 sps:$4 sm:$0xff]  }
  0x57   : > { %1570 = vmatprep.mubr.msk.bf16.mxu0 %vm312_vm0, %v2302_v27  ;;  %1571 = vmatprep.mubr.msk.bf16.mxu1 %vm312_vm0, %v2190_v44  ;;  %v2616_v44 = vld [vmem:[#allocation12_spill] sm:$0xff] }
  0x59   : > { %1019 = vmatpush1.bf16.msra.mxu0 %v2312_v62  ;;  %1066 = vmatpush1.bf16.msra.mxu1 %v1801_v6  ;;  %v2344_v6 = vld [vmem:[%s2517_s1 + $0x280] ss:$8 sps:$4 sm:$0xff]  }
  0x5a   : > { %1020 = vmatprep.subr.bf16.mxu0 %v2319_v49  ;;  %1067 = vmatprep.subr.bf16.mxu1 %v1813_v8  ;;  %v2351_v8 = vld [vmem:[%s2517_s1 + $0x274] ss:$8 sps:$4 sm:$0xff]  }
  0x5d   : > { %1021 = vmatpush1.bf16.msra.mxu0 %v2330_v2  ;;  %1068 = vmatpush1.bf16.msra.mxu1 %v1823_v10  ;;  %v2358_v10 = vld [vmem:[%s2517_s1 + $0x270] ss:$8 sps:$4 sm:$0xff]  }
  0x5e   : > { %1022 = vmatprep.subr.bf16.mxu0 %v2337_v4  ;;  %1069 = vmatprep.subr.bf16.mxu1 %v1835_v12  ;;  %v2365_v12 = vld [vmem:[%s2517_s1 + $0x264] ss:$8 sps:$4 sm:$0xff]  }
  0x61   : > { %1023 = vmatpush1.bf16.msra.mxu0 %v2344_v6  ;;  %1070 = vmatpush1.bf16.msra.mxu1 %v1849_v14  ;;  %v2372_v14 = vld [vmem:[%s2517_s1 + $0x260] ss:$8 sps:$4 sm:$0xff]  }
  0x62   : > { %1024 = vmatprep.subr.bf16.mxu0 %v2351_v8  ;;  %1071 = vmatprep.subr.bf16.mxu1 %v1861_v16  ;;  %v2379_v16 = vld [vmem:[%s2517_s1 + $0x254] ss:$8 sps:$4 sm:$0xff]  }
  0x65   : > { %1025 = vmatpush1.bf16.msra.mxu0 %v2358_v10  ;;  %1072 = vmatpush1.bf16.msra.mxu1 %v1877_v18  ;;  %v2386_v18 = vld [vmem:[%s2517_s1 + $0x250] ss:$8 sps:$4 sm:$0xff]  }
  0x66   : > { %1026 = vmatprep.subr.bf16.mxu0 %v2365_v12  ;;  %1073 = vmatprep.subr.bf16.mxu1 %v1889_v20  ;;  %v2393_v20 = vld [vmem:[%s2517_s1 + $0x244] ss:$8 sps:$4 sm:$0xff]  }
  0x69   : > { %1027 = vmatpush1.bf16.msra.mxu0 %v2372_v14  ;;  %1074 = vmatpush1.bf16.msra.mxu1 %v1902_v22  ;;  %v2400_v22 = vld [vmem:[%s2517_s1 + $0x240] ss:$8 sps:$4 sm:$0xff]  }
  0x6a   : > { %1028 = vmatprep.subr.bf16.mxu0 %v2379_v16  ;;  %1075 = vmatprep.subr.bf16.mxu1 %v1914_v24  ;;  %v2407_v24 = vld [vmem:[%s2517_s1 + $0x2c4] ss:$8 sps:$4 sm:$0xff]  }
  0x6d   : > { %1029 = vmatpush1.bf16.msra.mxu0 %v2386_v18  ;;  %1076 = vmatpush1.bf16.msra.mxu1 %v1931_v26  ;;  %v2414_v26 = vld [vmem:[%s2517_s1 + $0x2c0] ss:$8 sps:$4 sm:$0xff]  }
  0x6e   : > { %1030 = vmatprep.subr.bf16.mxu0 %v2393_v20  ;;  %1077 = vmatprep.subr.bf16.mxu1 %v1950_v31  ;;  %v2601_v31 = vld [vmem:[#allocation4_spill] sm:$0xff] }
  0x71   : > { %1031 = vmatpush1.bf16.msra.mxu0 %v2400_v22  ;;  %1078 = vmatpush1.bf16.msra.mxu1 %v1967_v36  ;;  %v2605_v36 = vld [vmem:[#allocation6_spill] sm:$0xff] }
  0x72   : > { %1046 = vmatprep.subr.bf16.mxu0 %v2407_v24  ;;  %1093 = vmatprep.subr.bf16.mxu1 %v1981_v38  ;;  %v2607_v38 = vld [vmem:[#allocation7_spill] sm:$0xff] }
  0x75   : > { %1047 = vmatpush2.bf16.msra.mxu0 %v2414_v26  ;;  %1094 = vmatpush2.bf16.msra.mxu1 %v1993_v40  ;;  %v2608_v40 = vld [vmem:[#allocation32_spill] sm:$0xff] }
  0x76   : > { %1106 = vmatprep.subr.bf16.mxu0 %v1772_v1  ;;  %1149 = vmatprep.subr.bf16.mxu1 %v2014_v46  ;;  %v2596_v1 = vld [vmem:[#allocation20_spill] sm:$0xff] }
  0x77   : > { %v2609_v46 = vld [vmem:[#allocation8_spill] sm:$0xff] }
  0x78   : > { %1049 = vmatmul.mubr.bf16.vlgmr.msra.gmra.mxu0 %v2294_v41  ;;  %1096 = vmatmul.mubr.bf16.vlgmr.msra.gmra.mxu1 %v2276_v55 }
  0x79   : > { %1107 = vmatpush1.bf16.msra.mxu0 %v1783_v3  ;;  %1150 = vmatpush1.bf16.msra.mxu1 %v2030_v50  ;;  %v2597_v3 = vld [vmem:[#allocation2_spill] sm:$0xff] }
  0x7a   : > { %1108 = vmatprep.subr.bf16.mxu0 %v1796_v5  ;;  %1151 = vmatprep.subr.bf16.mxu1 %v2042_v52  ;;  %v2598_v5 = vld [vmem:[#allocation22_spill] sm:$0xff]  ;;  %v2611_v52 = vld [vmem:[#allocation9_spill] sm:$0xff] }
  0x7b   : > { %1572 = vmatprep.mubr.msk.bf16.mxu0 %vm312_vm0, %v1958_v33  ;;  %1573 = vmatprep.mubr.msk.bf16.mxu1 %vm312_vm0, %v2200_v23  ;;  %v2603_v33 = vld [vmem:[#allocation5_spill] sm:$0xff]  ;;  %v2610_v50 = vld [vmem:[#allocation34_spill] sm:$0xff] }
  0x7c   : > { %v2617_v23 = vld [vmem:[#allocation13_spill] sm:$0xff] }
  0x7d   : > { %1109 = vmatpush1.bf16.msra.mxu0 %v1807_v7  ;;  %1152 = vmatpush1.bf16.msra.mxu1 %v2055_v54  ;;  %v2599_v7 = vld [vmem:[#allocation3_spill] sm:$0xff]  ;;  %v2612_v54 = vld [vmem:[#allocation36_spill] sm:$0xff] }
  0x7e   : > { %1110 = vmatprep.subr.bf16.mxu0 %v1818_v9  ;;  %1153 = vmatprep.subr.bf16.mxu1 %v2067_v56  ;;  %v2600_v9 = vld [vmem:[#allocation24_spill] sm:$0xff]  ;;  %v2613_v56 = vld [vmem:[#allocation10_spill] sm:$0xff] }
  0x81   : > { %1111 = vmatpush1.bf16.msra.mxu0 %v1828_v11  ;;  %1154 = vmatpush1.bf16.msra.mxu1 %v2079_v58  ;;  %v2602_v11 = vld [vmem:[#allocation26_spill] sm:$0xff] }
  0x82   : > { %1112 = vmatprep.subr.bf16.mxu0 %v1842_v13  ;;  %1155 = vmatprep.subr.bf16.mxu1 %v2091_v60  ;;  %v2604_v13 = vld [vmem:[#allocation28_spill] sm:$0xff]  ;;  %v2614_v58 = vld [vmem:[#allocation38_spill] sm:$0xff]  ;;  %v2615_v60 = vld [vmem:[#allocation11_spill] sm:$0xff] }
  0x85   : > { %1113 = vmatpush1.bf16.msra.mxu0 %v1856_v15  ;;  %1156 = vmatpush1.bf16.msra.mxu1 %v2596_v1  ;;  %v2606_v15 = vld [vmem:[#allocation30_spill] sm:$0xff] }
  0x86   : > { %1114 = vmatprep.subr.bf16.mxu0 %v2597_v3  ;;  %1157 = vmatprep.subr.bf16.mxu1 %v2598_v5 }
  0x89   : > { %1115 = vmatpush1.bf16.msra.mxu0 %v2599_v7  ;;  %1158 = vmatpush1.bf16.msra.mxu1 %v2600_v9 }
  0x8a   : > { %1116 = vmatprep.subr.bf16.mxu0 %v2601_v31  ;;  %1159 = vmatprep.subr.bf16.mxu1 %v2602_v11 }
  0x8d   : > { %1117 = vmatpush1.bf16.msra.mxu0 %v2603_v33  ;;  %1160 = vmatpush1.bf16.msra.mxu1 %v2604_v13 }
  0x8e   : > { %1118 = vmatprep.subr.bf16.mxu0 %v2605_v36  ;;  %1161 = vmatprep.subr.bf16.mxu1 %v2606_v15 }
  0x91   : > { %1119 = vmatpush1.bf16.msra.mxu0 %v2607_v38  ;;  %1162 = vmatpush1.bf16.msra.mxu1 %v2608_v40 }
  0x92   : > { %1120 = vmatprep.subr.bf16.mxu0 %v2609_v46  ;;  %1163 = vmatprep.subr.bf16.mxu1 %v2610_v50 }
  0x95   : > { %1121 = vmatpush1.bf16.msra.mxu0 %v2611_v52  ;;  %1164 = vmatpush1.bf16.msra.mxu1 %v2612_v54 }
  0x96   : > { %1136 = vmatprep.subr.bf16.mxu0 %v2613_v56  ;;  %1179 = vmatprep.subr.bf16.mxu1 %v2614_v58 }
  0x99   : > { %1137 = vmatpush2.bf16.msra.mxu0 %v2615_v60  ;;  %1180 = vmatpush2.bf16.msra.mxu1 %v2245_v30  ;;  %v2621_v30 = vld [vmem:[#allocation17_spill] sm:$0xff] }
  0x9a   : > { %1196 = vmatprep.subr.bf16.mxu0 %v2616_v44  ;;  %1265 = vmatprep.subr.bf16.mxu1 %v2267_v47  ;;  %v2625_v47 = vld [vmem:[#allocation23_spill] sm:$0xff] }
  0x9c   : > { %1139 = vmatmul.mubr.bf16.vlgmr.msra.gmra.mxu0 %v2617_v23  ;;  %1182 = vmatmul.mubr.bf16.vlgmr.msra.gmra.mxu1 %v2279_v29 }
  0x9d   : > { %1197 = vmatpush1.bf16.msra.mxu0 %v2618_v63  ;;  %1266 = vmatpush1.bf16.msra.mxu1 %v2284_v37 }
  0x9e   : > { %1198 = vmatprep.subr.bf16.mxu0 %v2619_v17  ;;  %1267 = vmatprep.subr.bf16.mxu1 %v2291_v35 }
  0x9f   : > { %1574 = vmatprep.mubr.msk.bf16.mxu0 %vm312_vm0, %v2302_v27  ;;  %1579 = vmatprep.mubr.msk.bf16.mxu1 %vm312_vm0, %v2297_v19 }
  0xa1   : > { %1199 = vmatpush1.bf16.msra.mxu0 %v2620_v53  ;;  %1268 = vmatpush1.bf16.msra.mxu1 %v2312_v62 }
  0xa2   : > { %1200 = vmatprep.subr.bf16.mxu0 %v2621_v30  ;;  %1269 = vmatprep.subr.bf16.mxu1 %v2319_v49 }
  0xa5   : > { %1201 = vmatpush1.bf16.msra.mxu0 %v2622_v57  ;;  %1270 = vmatpush1.bf16.msra.mxu1 %v2330_v2 }
  0xa6   : > { %1202 = vmatprep.subr.bf16.mxu0 %v2623_v28  ;;  %1271 = vmatprep.subr.bf16.mxu1 %v2337_v4 }
  0xa9   : > { %1203 = vmatpush1.bf16.msra.mxu0 %v2624_v59  ;;  %1272 = vmatpush1.bf16.msra.mxu1 %v2344_v6 }
  0xaa   : > { %1204 = vmatprep.subr.bf16.mxu0 %v2625_v47  ;;  %1273 = vmatprep.subr.bf16.mxu1 %v2351_v8 }
  0xad   : > { %1205 = vmatpush1.bf16.msra.mxu0 %v2626_v61  ;;  %1274 = vmatpush1.bf16.msra.mxu1 %v2358_v10 }
  0xae   : > { %1206 = vmatprep.subr.bf16.mxu0 %v2627_v48  ;;  %1275 = vmatprep.subr.bf16.mxu1 %v2365_v12 }
  0xb1   : > { %1207 = vmatpush1.bf16.msra.mxu0 %v2628_v51  ;;  %1276 = vmatpush1.bf16.msra.mxu1 %v2372_v14 }
  0xb2   : > { %1208 = vmatprep.subr.bf16.mxu0 %v2629_v34  ;;  %1277 = vmatprep.subr.bf16.mxu1 %v2379_v16 }
  0xb5   : > { %1209 = vmatpush1.bf16.msra.mxu0 %v2630_v42  ;;  %1278 = vmatpush1.bf16.msra.mxu1 %v2386_v18 }
  0xb6   : > { %1210 = vmatprep.subr.bf16.mxu0 %v2631_v21  ;;  %1279 = vmatprep.subr.bf16.mxu1 %v2393_v20 }
  0xb9   : > { %1211 = vmatpush1.bf16.msra.mxu0 %v2632_v45  ;;  %1280 = vmatpush1.bf16.msra.mxu1 %v2400_v22 }
  0xba   : > { %1226 = vmatprep.subr.bf16.mxu0 %v2633_v39  ;;  %1295 = vmatprep.subr.bf16.mxu1 %v2407_v24 }
  0xbd   : > { %1227 = vmatpush2.bf16.msra.mxu0 %v2250_v32  ;;  %1296 = vmatpush2.bf16.msra.mxu1 %v2414_v26 }
  0xc0   : > { %1229 = vmatmul.mubr.bf16.vlgmr.msra.gmra.mxu0 %v2294_v41  ;;  %1298 = vmatmul.mubr.bf16.vlgmr.msra.gmra.mxu1 %v2305_v0 }
  0xf0   : > { %v350_v55 = vpop.f32.mrf.mxu0  ;;  %v486_v29 = vpop.f32.mrf.mxu1 }
  0xf1   : > { %v487_v31 = vadd.f32 %v486_v29, %v350_v55 }
  0xf2   : > { %v352_v37 = vpop.f32.mrf.mxu0  ;;  %v488_v43 = vpop.f32.mrf.mxu1 }
  0xf3   : > { %v489_v11 = vadd.f32 %v488_v43, %v352_v37 }
  0xf4   : > { %v354_v35 = vpop.f32.mrf.mxu0  ;;  %v490_v19 = vpop.f32.mrf.mxu1 }
  0xf5   : > { %v491_v50 = vadd.f32 %v490_v19, %v354_v35 }
  0xf6   : > { %v356_v25 = vpop.f32.mrf.mxu0  ;;  %v492_v27 = vpop.f32.mrf.mxu1 }
  0xf7   : > { %v493_v52 = vadd.f32 %v492_v27, %v356_v25  ;;  %v1580_v25 = vld [vmem:[%s2518_s2] ss:$0 sm:$0xff] }
 0x114   : > { %v677_v62 = vpop.f32.mrf.mxu0  ;;  %v871_v49 = vpop.f32.mrf.mxu1 }
 0x115   : > { %v686_v13 = vadd.f32 %v677_v62, %v487_v31 }
 0x116   : > { %v679_v2 = vpop.f32.mrf.mxu0  ;;  %v873_v4 = vpop.f32.mrf.mxu1 }
 0x117   : > { %v687_v38 = vadd.f32 %v679_v2, %v489_v11  ;;  %v880_v23 = vadd.f32 %v871_v49, %v686_v13 }
 0x118   : > { %v681_v6 = vpop.f32.mrf.mxu0  ;;  %v875_v32 = vpop.f32.mrf.mxu1 }
 0x119   : > { %v688_v63 = vadd.f32 %v681_v6, %v491_v50  ;;  %v881_v57 = vadd.f32 %v873_v4, %v687_v38 }
 0x11a   : > { %v683_v8 = vpop.f32.mrf.mxu0  ;;  %v877_v10 = vpop.f32.mrf.mxu1 }
 0x11b   : > { %v689_v17 = vadd.f32 %v683_v8, %v493_v52  ;;  %v882_v39 = vadd.f32 %v875_v32, %v688_v63 }
 0x11d   : > { %v883_v55 = vadd.f32 %v877_v10, %v689_v17 }
 0x138   : > { %v1050_v12 = vpop.f32.mrf.mxu0  ;;  %v1097_v41 = vpop.f32.mrf.mxu1 }
 0x139   : > { %v1059_v61 = vadd.f32 %v1050_v12, %v880_v23 }
 0x13a   : > { %v1052_v14 = vpop.f32.mrf.mxu0  ;;  %v1099_v0 = vpop.f32.mrf.mxu1 }
 0x13b   : > { %v1060_v34 = vadd.f32 %v1052_v14, %v881_v57 }
 0x13c   : > { %v1054_v16 = vpop.f32.mrf.mxu0  ;;  %v1101_v18 = vpop.f32.mrf.mxu1 }
 0x13d   : > { %v1061_v62 = vadd.f32 %v1054_v16, %v882_v39 }
 0x13e   : > { %v1056_v20 = vpop.f32.mrf.mxu0  ;;  %v1103_v22 = vpop.f32.mrf.mxu1 }
 0x13f   : > { %v1062_v49 = vadd.f32 %v1056_v20, %v883_v55 }
 0x15c   : > { %v1140_v24 = vpop.f32.mrf.mxu0  ;;  %v1183_v26 = vpop.f32.mrf.mxu1 }
 0x15d   : > { %v1141_v9 = vadd.f32 %v1140_v24, %v1097_v41 }
 0x15e   : > { %v1142_v1 = vpop.f32.mrf.mxu0  ;;  %v1185_v3 = vpop.f32.mrf.mxu1 }
 0x15f   : > { %v1143_v33 = vadd.f32 %v1142_v1, %v1099_v0  ;;  %v1192_v40 = vadd.f32 %v1183_v26, %v1141_v9 }
 0x160   : > { %v1144_v5 = vpop.f32.mrf.mxu0  ;;  %v1187_v7 = vpop.f32.mrf.mxu1 }
 0x161   : > { %v1145_v46 = vadd.f32 %v1144_v5, %v1101_v18  ;;  %v1193_v58 = vadd.f32 %v1185_v3, %v1143_v33 }
 0x162   : > { %v1146_v36 = vpop.f32.mrf.mxu0  ;;  %v1189_v15 = vpop.f32.mrf.mxu1 }
 0x163   : > { %v1147_v60 = vadd.f32 %v1146_v36, %v1103_v22  ;;  %v1194_v28 = vadd.f32 %v1187_v7, %v1145_v46 }
 0x165   : > { %v1195_v42 = vadd.f32 %v1189_v15, %v1147_v60 }
 0x180   : > { %v1230_v54 = vpop.f32.mrf.mxu0  ;;  %v1299_v56 = vpop.f32.mrf.mxu1 }
 0x181   : > { %v1239_v44 = vadd.f32 %v1230_v54, %v1192_v40 }
 0x182   : > { %v1232_v53 = vpop.f32.mrf.mxu0  ;;  %v1301_v30 = vpop.f32.mrf.mxu1 }
 0x183   : > { %v1308_v59 = vadd.f32 %v1299_v56, %v1239_v44  ;;  %v1240_v47 = vadd.f32 %v1232_v53, %v1193_v58 }
 0x184   : > { %v1234_v48 = vpop.f32.mrf.mxu0  ;;  %v1303_v51 = vpop.f32.mrf.mxu1 }
 0x185   : > { %v1309_v21 = vadd.f32 %v1301_v30, %v1240_v47  ;;  %v1241_v45 = vadd.f32 %v1234_v48, %v1194_v28  ;;  %v1312_v37 = vmax.f32 %v1059_v61, %v1308_v59 }
 0x186   : > { %v1236_v29 = vpop.f32.mrf.mxu0  ;;  %v1305_v27 = vpop.f32.mrf.mxu1 }
 0x187   : > { %v1313_v43 = vmax.f32 %v1060_v34, %v1309_v21  ;;  %v1310_v35 = vadd.f32 %v1303_v51, %v1241_v45  ;;  %v1242_v19 = vadd.f32 %v1236_v29, %v1195_v42 }
 0x189   : > { %v1316_v2 = vmax.f32 %v1312_v37, %v1313_v43  ;;  %v1311_v4 = vadd.f32 %v1305_v27, %v1242_v19  ;;  %v1314_v8 = vmax.f32 %v1061_v62, %v1310_v35 }
 0x18b   : > { %v1325_v6 = vadd.f32 %v1580_v25, %v1316_v2  ;;  %v1315_v12 = vmax.f32 %v1062_v49, %v1311_v4 }
 0x18d   : > { %v1327_v32 = vmax.f32 %v1325_v6, 0.0  ;;  %v1317_v10 = vmax.f32 %v1314_v8, %v1315_v12 }
 0x18f   : > { %1329 = vst [vmem:[%s170_s4] sm:$0xff] %v1327_v32  ;;  %v1326_v41 = vadd.f32 %v1580_v25, %v1317_v10 }
 0x191   : > { %v1328_v14 = vmax.f32 %v1326_v41, 0.0 }
 0x193   : > { %1330 = vst [vmem:[%s170_s4 + $0x8] sm:$0xff] %v1328_v14 }
 0x194 PF: > { %s13_s12 = sadd.s32 1, %s1734_s12  }
 0x195   : > { %p10_p4 = scmp.ge.s32.totalorder %s13_s12, 4  }
 0x197   :  { %12 = sbr.rel (!%p10_p4) target bundleno = 1 (0x1), region = 67 }

// kernel: convnet_forward.3
= control target key start
LH: loop header
LB: loop body
LE: loop exit
PB: predicated region body
PF: predicated region fallthrough
CT: control target
= control target key end

     0   :  { %10 = vsyncpa [#allocation3], 0  ;;  %s2993_s0 = inlined_call_operand.vmem [shape: f32[2,2,10,160], index: 0, kind: input, shape index: {}]   ;;  %s2994_s1 = inlined_call_operand.vmem [shape: bf16[5,160,256], index: 1, kind: input, shape index: {}]   ;;  %s2995_s2 = inlined_call_operand.vmem [shape: f32[1,128], index: 2, kind: input, shape index: {}]   ;;  %s2996_s3 = inlined_call_operand.vmem [shape: f32[128,10], index: 3, kind: input, shape index: {}]   ;;  %s2997_s4 = inlined_call_operand.vmem [shape: f32[1,10], index: 4, kind: input, shape index: {}]   ;;  %s2998_s5 = inlined_call_operand.hbm [shape: f32[2,1,10], index: 5, kind: output, shape index: {}]  }
   0x1   :  { %12 = vsyncpa [#allocation3 + $0x1], 0  ;;  %s2065_s18 = smov 0   ;;  %s2067_s19 = smov 0  }
   0x2   :  { %s2069_s20 = smov 0   ;;  %s2071_s21 = smov 0  }
   0x3 LB: > { %s2086_s22 = sadd.s32 4294967295, %s2030_s21   ;;  %s1516_s23 = sadd.s32 4294967294, %s2030_s21   ;;  %s2030_s21 = sphi %s2071_s21, %s3097_s21   ;;  %s2026_s20 = sphi %s2069_s20, %s3096_s20   ;;  %s2022_s19 = sphi %s2067_s19, %s3095_s19   ;;  %s2018_s18 = sphi %s2065_s18, %s3094_s18  }
   0x4   : > { %s2090_s24 = sadd.s32 1, %s2030_s21   ;;  %s135_s25 = sadd.s32 1, %s2026_s20 }
   0x5   : > { %s132_s26 = ssub.s32 %s2030_s21, %s2090_s24  ;;  %p145_p0 = scmp.ne.s32.totalorder %s2026_s20, %s2022_s19 }
   0x6   : > { %p133_p1 = scmp.eq.s32.totalorder %s132_s26, 0  ;;  %p146_p2 = scmp.eq.s32.totalorder %s2086_s22, 1 }
   0x7   : > { %p151_p3 = scmp.ne.s32.totalorder %s2022_s19, %s2018_s18  ;;  %p152_p4 = scmp.eq.s32.totalorder %s1516_s23, 1 }
   0x8   : > { %s2101_s27 = scalar_select %p133_p1, %s2026_s20, %s135_s25  }
   0x9   : > { %p2103_p5 = por %p146_p2, %p145_p0  ;;  %p2107_p6 = por %p152_p4, %p151_p3 }
   0xa   : > { %p1519_p7 = scmp.ge.s32.totalorder %s2030_s21, 1  ;;  %p190_p8 = scmp.lt.s32.totalorder %s2030_s21, 3 }
   0xc   : > { %p191_p9 = pnand %p1519_p7, %p190_p8 }
   0xe   : > { %194 = sbr.rel (%p191_p9) target bundleno = 647 (0x287), region = 40 }
  0x13   : > { %v2116_v0 = vld [vmem:[%s2994_s1 + $0x114] ss:$8 sps:$4 sm:$0xff]   ;;  %v2127_v2 = vld [vmem:[%s2994_s1 + $0x110] ss:$8 sps:$4 sm:$0xff]   ;;  %v2138_v4 = vld [vmem:[%s2994_s1 + $0x104] ss:$8 sps:$4 sm:$0xff]  }
  0x14   : > { %v2121_v1 = vld [vmem:[%s2994_s1 + $0x74] ss:$8 sps:$4 sm:$0xff]   ;;  %377 = vmatprep.subr.bf16.mxu0 %v2116_v0  ;;  %v2132_v3 = vld [vmem:[%s2994_s1 + $0x70] ss:$8 sps:$4 sm:$0xff]   ;;  %v2145_v5 = vld [vmem:[%s2994_s1 + $0x64] ss:$8 sps:$4 sm:$0xff]  }
  0x15   : > { %521 = vmatprep.subr.bf16.mxu1 %v2121_v1  ;;  %378 = vmatpush1.bf16.msra.mxu0 %v2127_v2  ;;  %v2150_v6 = vld [vmem:[%s2994_s1 + $0x100] ss:$8 sps:$4 sm:$0xff]   ;;  %v2162_v8 = vld [vmem:[%s2994_s1 + $0xf4] ss:$8 sps:$4 sm:$0xff]   ;;  %v2172_v10 = vld [vmem:[%s2994_s1 + $0xf0] ss:$8 sps:$4 sm:$0xff]  }
  0x16   : > { %522 = vmatpush1.bf16.msra.mxu1 %v2132_v3  ;;  %379 = vmatprep.subr.bf16.mxu0 %v2138_v4  ;;  %v2156_v7 = vld [vmem:[%s2994_s1 + $0x60] ss:$8 sps:$4 sm:$0xff]   ;;  %v2167_v9 = vld [vmem:[%s2994_s1 + $0x54] ss:$8 sps:$4 sm:$0xff]   ;;  %v2177_v11 = vld [vmem:[%s2994_s1 + $0x50] ss:$8 sps:$4 sm:$0xff]  }
  0x17   : > { %523 = vmatprep.subr.bf16.mxu1 %v2145_v5  ;;  %v2184_v12 = vld [vmem:[%s2994_s1 + $0xe4] ss:$8 sps:$4 sm:$0xff]   ;;  %v2196_v14 = vld [vmem:[%s2994_s1 + $0xe0] ss:$8 sps:$4 sm:$0xff]   ;;  %v2208_v16 = vld [vmem:[%s2994_s1 + $0xd4] ss:$8 sps:$4 sm:$0xff]  }
  0x18   : > { %v2191_v13 = vld [vmem:[%s2994_s1 + $0x44] ss:$8 sps:$4 sm:$0xff]   ;;  %v2203_v15 = vld [vmem:[%s2994_s1 + $0x40] ss:$8 sps:$4 sm:$0xff]   ;;  %p217_p10 = scmp.lt.s32.totalorder %s2086_s22, 1  ;;  %vm373_vm0 = vcmask 261120  }
  0x19   : > { %380 = vmatpush1.bf16.msra.mxu0 %v2150_v6  ;;  %v2216_v17 = vld [vmem:[%s2994_s1 + $0x34] ss:$8 sps:$4 sm:$0xff]   ;;  %v2221_v18 = vld [vmem:[%s2994_s1 + $0xd0] ss:$8 sps:$4 sm:$0xff]   ;;  %v2233_v20 = vld [vmem:[%s2994_s1 + $0xc4] ss:$8 sps:$4 sm:$0xff]  }
  0x1a   : > { %524 = vmatpush1.bf16.msra.mxu1 %v2156_v7  ;;  %381 = vmatprep.subr.bf16.mxu0 %v2162_v8  ;;  %v2226_v19 = vld [vmem:[%s2994_s1 + $0x30] ss:$8 sps:$4 sm:$0xff]   ;;  %s218_s15 = scalar_select %p217_p10, %s2086_s22, 1  ;;  %v2241_v21 = vld [vmem:[%s2994_s1 + $0x24] ss:$8 sps:$4 sm:$0xff]   ;;  %vm2033_vm1 = vmmov 0  }
  0x1b   : > { %525 = vmatprep.subr.bf16.mxu1 %v2167_v9  ;;  %v2246_v22 = vld [vmem:[%s2994_s1 + $0xc0] ss:$8 sps:$4 sm:$0xff]   ;;  %v2258_v24 = vld [vmem:[%s2994_s1 + $0xb4] ss:$8 sps:$4 sm:$0xff]   ;;  %v2270_v26 = vld [vmem:[%s2994_s1 + $0xb0] ss:$8 sps:$4 sm:$0xff]  }
  0x1c   : > { %v2253_v23 = vld [vmem:[%s2994_s1 + $0x20] ss:$8 sps:$4 sm:$0xff]   ;;  %s1726_s8 = sshll.u32 %s218_s15, 6  ;;  %v2265_v25 = vld [vmem:[%s2994_s1 + $0x14] ss:$8 sps:$4 sm:$0xff]   ;;  %s215_s12 = sand.u32 1, %s2022_s19  }
  0x1d   : > { %382 = vmatpush1.bf16.msra.mxu0 %v2172_v10  ;;  %v2275_v27 = vld [vmem:[%s2994_s1 + $0x10] ss:$8 sps:$4 sm:$0xff]   ;;  %s2280_s17 = scalar_lea.vmem %s2993_s0, %s1726_s8  ;;  %v2287_v28 = vld [vmem:[%s2994_s1 + $0xa4] ss:$8 sps:$4 sm:$0xff]   ;;  %v2300_v31 = vld [vmem:[%s2994_s1 + $0xa0] ss:$8 sps:$4 sm:$0xff]  }
  0x1e   : > { %526 = vmatpush1.bf16.msra.mxu1 %v2177_v11  ;;  %383 = vmatprep.subr.bf16.mxu0 %v2184_v12  ;;  %3032 = vst [vmem:[#allocation5_spill] sm:$0xff] %v2275_v27  ;;  %v2294_v29 = vld [vmem:[%s2994_s1 + $0x4] ss:$8 sps:$4 sm:$0xff]   ;;  %v2305_v32 = vld [vmem:[%s2994_s1] ss:$8 sps:$4 sm:$0xff]   ;;  %s1723_s15 = sshll.u32 %s2086_s22, 4 }
  0x1f   : > { %527 = vmatprep.subr.bf16.mxu1 %v2191_v13  ;;  %3033 = vst [vmem:[#allocation6_spill] sm:$0xff] %v2294_v29  ;;  %v1523_v30 = vld [vmem:[%s2280_s17 + $0x28] sm:$0xff]  ;;  %3034 = vst [vmem:[#allocation7_spill] sm:$0xff] %v2305_v32  ;;  %v2315_v35 = vld [vmem:[%s2994_s1 + $0x134] ss:$8 sps:$4 sm:$0xff]   ;;  %s216_s16 = scalar_lea.vmem [#allocation2], %s215_s12  ;;  %s2958_s30 = scalar_lea.hbm %s2998_s5, %s1723_s15 }
  0x20   : > { %v2307_v33 = vpack.c.bf16 %v1523_v30, %v1523_v30  ;;  %v224_v34 = vld [vmem:[%s2280_s17 + $0x8] sm:$0xff]  ;;  %v2322_v37 = vld [vmem:[%s2994_s1 + $0x94] ss:$8 sps:$4 sm:$0xff]   ;;  %v2330_v38 = vld [vmem:[%s2994_s1 + $0x130] ss:$8 sps:$4 sm:$0xff]   ;;  %s1461_s23 = sshll.u32 %s216_s16, 4  ;;  %s1462_s23 = int_to_ptr.vmem [resolvable:$true] %s1461_s23 }
  0x21   : > { %384 = vmatpush1.bf16.msra.mxu0 %v2196_v14  ;;  %v226_v36 = vpack.c.bf16 %v224_v34, %v224_v34  ;;  %3035 = vst [vmem:[#allocation8_spill] sm:$0xff] %v2322_v37  ;;  %v2335_v39 = vld [vmem:[%s2994_s1 + $0x90] ss:$8 sps:$4 sm:$0xff]   ;;  %v2342_v40 = vld [vmem:[%s2994_s1 + $0x124] ss:$8 sps:$4 sm:$0xff]   ;;  %vm1446_vm2 = vcmask 73728  }
  0x22   : > { %528 = vmatpush1.bf16.msra.mxu1 %v2203_v15  ;;  %385 = vmatprep.subr.bf16.mxu0 %v2208_v16  ;;  %3036 = vst [vmem:[#allocation9_spill] sm:$0xff] %v2335_v39  ;;  %v2349_v41 = vld [vmem:[%s2994_s1 + $0x84] ss:$8 sps:$4 sm:$0xff]   ;;  %v2354_v42 = vld [vmem:[%s2994_s1 + $0x120] ss:$8 sps:$4 sm:$0xff]   ;;  %s1449_s6 = scalar_lea.sflag [#allocation3], %s215_s12 }
  0x23   : > { %529 = vmatprep.subr.bf16.mxu1 %v2216_v17  ;;  %1564 = vmatprep.mubr.msk.bf16.mxu0 %vm373_vm0, %v2307_v33  ;;  %3037 = vst [vmem:[#allocation10_spill] sm:$0xff] %v2349_v41  ;;  %v2359_v43 = vld [vmem:[%s2994_s1 + $0x80] ss:$8 sps:$4 sm:$0xff]   ;;  %v2368_v46 = vld [vmem:[%s2994_s1 + $0x1b4] ss:$8 sps:$4 sm:$0xff]   ;;  %s1970_s7 = scalar_lea.vmem %s1462_s23, 16 }
  0x24   : > { %1585 = vmatprep.mubr.msk.bf16.mxu1 %vm373_vm0, %v226_v36  ;;  %3038 = vst [vmem:[#allocation11_spill] sm:$0xff] %v2359_v43  ;;  %v1522_v44 = vld [vmem:[%s2280_s17 + $0x20] sm:$0xff]  ;;  %v2375_v47 = vld [vmem:[%s2994_s1 + $0x254] ss:$8 sps:$4 sm:$0xff]   ;;  %v2382_v50 = vld [vmem:[%s2994_s1 + $0x1b0] ss:$8 sps:$4 sm:$0xff]   ;;  %p1971_p11 = scmp.ne.s32.totalorder %s1462_s23, %s1970_s7 }
  0x25   : > { %386 = vmatpush1.bf16.msra.mxu0 %v2221_v18  ;;  %v223_v45 = vld [vmem:[%s2280_s17] sm:$0xff]  ;;  %3039 = vst [vmem:[#allocation12_spill] sm:$0xff] %v2375_v47  ;;  %v2377_v48 = vpack.c.bf16 %v1522_v44, %v1522_v44  ;;  %v2387_v51 = vld [vmem:[%s2994_s1 + $0x250] ss:$8 sps:$4 sm:$0xff]   ;;  %v2419_v56 = vld [vmem:[%s2994_s1 + $0x194] ss:$8 sps:$4 sm:$0xff]  }
  0x26   : > { %530 = vmatpush1.bf16.msra.mxu1 %v2226_v19  ;;  %387 = vmatprep.subr.bf16.mxu0 %v2233_v20  ;;  %v225_v49 = vpack.c.bf16 %v223_v45, %v223_v45  ;;  %3041 = vst [vmem:[#allocation14_spill] sm:$0xff] %v2387_v51  ;;  %v2394_v52 = vld [vmem:[%s2994_s1 + $0x1a4] ss:$8 sps:$4 sm:$0xff]   ;;  %v2407_v54 = vld [vmem:[%s2994_s1 + $0x1a0] ss:$8 sps:$4 sm:$0xff]   ;;  %p1972_p12 = pnand %p1971_p11, %p2103_p5  ;;  %s2034_s22 = smov [#allocation2]  }
  0x27   : > { %531 = vmatprep.subr.bf16.mxu1 %v2241_v21  ;;  %3040 = vst [vmem:[#allocation13_spill] sm:$0xff] %v2377_v48  ;;  %v2401_v53 = vld [vmem:[%s2994_s1 + $0x244] ss:$8 sps:$4 sm:$0xff]   ;;  %v2412_v55 = vld [vmem:[%s2994_s1 + $0x240] ss:$8 sps:$4 sm:$0xff]   ;;  %s1974_s8 = sshll.u32 %s2034_s22, 4  ;;  %s1975_s8 = int_to_ptr.vmem [resolvable:$false] %s1974_s8 }
  0x28   : > { %3042 = vst [vmem:[#allocation15_spill] sm:$0xff] %v2401_v53  ;;  %3043 = vst [vmem:[#allocation16_spill] sm:$0xff] %v2412_v55  ;;  %v2426_v57 = vld [vmem:[%s2994_s1 + $0x234] ss:$8 sps:$4 sm:$0xff]   ;;  %v2431_v58 = vld [vmem:[%s2994_s1 + $0x190] ss:$8 sps:$4 sm:$0xff]   ;;  %p1973_p13 = pneg %p1972_p12  ;;  %p1977_p0 = scmp.lt.s32.totalorder %s1462_s23, %s1975_s8 }
  0x29   : > { %388 = vmatpush1.bf16.msra.mxu0 %v2246_v22  ;;  %3044 = vst [vmem:[#allocation17_spill] sm:$0xff] %v2426_v57  ;;  %v2436_v59 = vld [vmem:[%s2994_s1 + $0x230] ss:$8 sps:$4 sm:$0xff]   ;;  %v2443_v60 = vld [vmem:[%s2994_s1 + $0x184] ss:$8 sps:$4 sm:$0xff]   ;;  %s1976_s9 = scalar_lea.vmem %s1975_s8, 32 }
  0x2a   : > { %532 = vmatpush1.bf16.msra.mxu1 %v2253_v23  ;;  %389 = vmatprep.subr.bf16.mxu0 %v2258_v24  ;;  %3045 = vst [vmem:[#allocation18_spill] sm:$0xff] %v2436_v59  ;;  %v2450_v61 = vld [vmem:[%s2994_s1 + $0x224] ss:$8 sps:$4 sm:$0xff]   ;;  %v2455_v62 = vld [vmem:[%s2994_s1 + $0x180] ss:$8 sps:$4 sm:$0xff]   ;;  %p1978_p1 = scmp.lt.s32.totalorder %s1976_s9, %s1970_s7 }
  0x2b   : > { %533 = vmatprep.subr.bf16.mxu1 %v2265_v25  ;;  %3046 = vst [vmem:[#allocation19_spill] sm:$0xff] %v2450_v61  ;;  %v2460_v63 = vld [vmem:[%s2994_s1 + $0x220] ss:$8 sps:$4 sm:$0xff]   ;;  %v2467_v30 = vld [vmem:[%s2994_s1 + $0x174] ss:$8 sps:$4 sm:$0xff]  }
  0x2c   : > { %3047 = vst [vmem:[#allocation20_spill] sm:$0xff] %v2460_v63  ;;  %v2474_v34 = vld [vmem:[%s2994_s1 + $0x214] ss:$8 sps:$4 sm:$0xff]   ;;  %v563_v36 = vld [vmem:[%s2280_s17 + $0x8] sm:$0xfe]  ;;  %p1979_p2 = por %p1978_p1, %p1977_p0 }
  0x2d   : > { %390 = vmatpush1.bf16.msra.mxu0 %v2270_v26  ;;  %3048 = vst [vmem:[#allocation21_spill] sm:$0xff] %v2474_v34  ;;  %v565_v44 = vld [vmem:[%s2280_s17 + $0x18] sm:$0x1]  ;;  %v1628_v45 = vld [vmem:[%s2280_s17 + $0x28] sm:$0xfe] }
  0x2e   : > { %534 = vmatpush1.bf16.msra.mxu1 %v2275_v27  ;;  %391 = vmatprep.subr.bf16.mxu0 %v2287_v28  ;;  %v939_v27 = vld [vmem:[%s2280_s17 + $0x8] sm:$0xfc]  ;;  %p1980_p3 = pnand %p1979_p2, %p1973_p13 }
  0x2f   : > { %535 = vmatprep.subr.bf16.mxu1 %v2294_v29 }
  0x31   : > { %392 = vmatpush1.bf16.msra.mxu0 %v2300_v31 }
  0x32   : > { %536 = vmatpush1.bf16.msra.mxu1 %v2305_v32  ;;  %405 = vmatprep.subr.bf16.mxu0 %v2315_v35  ;;  %v1629_v32 = vld [vmem:[%s2280_s17 + $0x30] sm:$0x1] }
  0x33   : > { %549 = vmatprep.subr.bf16.mxu1 %v2322_v37  ;;  %v1627_v37 = vld [vmem:[%s2280_s17 + $0x20] sm:$0xfe] }
  0x35   : > { %406 = vmatpush2.bf16.msra.mxu0 %v2330_v38 }
  0x36   : > { %550 = vmatpush2.bf16.msra.mxu1 %v2335_v39  ;;  %407 = vmatprep.subr.bf16.mxu0 %v2342_v40 }
  0x37   : > { %551 = vmatprep.subr.bf16.mxu1 %v2349_v41 }
  0x39   : > { %408 = vmatpush2.bf16.msra.mxu0 %v2354_v42 }
  0x3a   : > { %552 = vmatpush2.bf16.msra.mxu1 %v2359_v43  ;;  %707 = vmatprep.subr.bf16.mxu0 %v2368_v46 }
  0x3b   : > { %895 = vmatprep.subr.bf16.mxu1 %v2375_v47 }
  0x3c   : > { %410 = vmatmul.mubr.bf16.vlgmr.msra.gmra.mxu0 %v2377_v48 }
  0x3d   : > { %554 = vmatmul.mubr.bf16.vlgmr.msra.gmra.mxu1 %v225_v49  ;;  %708 = vmatpush1.bf16.msra.mxu0 %v2382_v50  ;;  %v1630_v49 = vld [vmem:[%s2280_s17 + $0x38] sm:$0x1] }
  0x3e   : > { %896 = vmatpush1.bf16.msra.mxu1 %v2387_v51  ;;  %709 = vmatprep.subr.bf16.mxu0 %v2394_v52  ;;  %v2507_v51 = vld [vmem:[%s2994_s1 + $0x160] ss:$8 sps:$4 sm:$0xff]  }
  0x3f   : > { %897 = vmatprep.subr.bf16.mxu1 %v2401_v53  ;;  %v755_v53 = vpack.c.bf16 %v1630_v49, %v1628_v45  ;;  %v2519_v45 = vld [vmem:[%s2994_s1 + $0x154] ss:$8 sps:$4 sm:$0xff]  }
  0x40   : > { %3052 = vst [vmem:[#allocation25_spill] sm:$0xff] %v2519_v45 }
  0x41   : > { %710 = vmatpush1.bf16.msra.mxu0 %v2407_v54  ;;  %v785_v43 = vshrl.u32 %v755_v53, 16 }
  0x42   : > { %898 = vmatpush1.bf16.msra.mxu1 %v2412_v55  ;;  %711 = vmatprep.subr.bf16.mxu0 %v2419_v56  ;;  %v567_v55 = vpack.c.bf16 %v565_v44, %v563_v36  ;;  %v787_v36 = vshll.u32 %v755_v53, 16  ;;  %v2512_v44 = vld [vmem:[%s2994_s1 + $0x200] ss:$8 sps:$4 sm:$0xff]   ;;  %v2524_v53 = vld [vmem:[%s2994_s1 + $0x1f4] ss:$8 sps:$4 sm:$0xff]  }
  0x43   : > { %899 = vmatprep.subr.bf16.mxu1 %v2426_v57  ;;  %v2495_v57 = vld [vmem:[%s2994_s1 + $0x164] ss:$8 sps:$4 sm:$0xff]   ;;  %3051 = vst [vmem:[#allocation24_spill] sm:$0xff] %v2512_v44  ;;  %3053 = vst [vmem:[#allocation26_spill] sm:$0xff] %v2524_v53 }
  0x44   : > { %v597_v48 = vshrl.u32 %v567_v55, 16  ;;  %v599_v47 = vshll.u32 %v567_v55, 16  ;;  %v789_v49 = vrot.slane %v787_v36, 1  ;;  %v562_v36 = vld [vmem:[%s2280_s17] sm:$0xfe] }
  0x45   : > { %712 = vmatpush1.bf16.msra.mxu0 %v2431_v58 }
  0x46   : > { %900 = vmatpush1.bf16.msra.mxu1 %v2436_v59  ;;  %713 = vmatprep.subr.bf16.mxu0 %v2443_v60  ;;  %v2485_v59 = vld [vmem:[%s2994_s1 + $0x170] ss:$8 sps:$4 sm:$0xff]   ;;  %v601_v55 = vrot.slane %v599_v47, 1  ;;  %v2540_v39 = vor.u32 %v789_v49, %v785_v43  ;;  %v2545_v47 = vld [vmem:[%s2994_s1 + $0x144] ss:$8 sps:$4 sm:$0xff]   ;;  %v754_v49 = vpack.c.bf16 %v1629_v32, %v1627_v37 }
  0x47   : > { %901 = vmatprep.subr.bf16.mxu1 %v2450_v61  ;;  %v2490_v61 = vld [vmem:[%s2994_s1 + $0x210] ss:$8 sps:$4 sm:$0xff]   ;;  %3056 = vst [vmem:[#allocation29_spill] sm:$0xff] %v2545_v47  ;;  %v2558_v43 = vld [vmem:[%s2994_s1 + $0x1e4] ss:$8 sps:$4 sm:$0xff]  }
  0x48   : > { %3049 = vst [vmem:[#allocation22_spill] sm:$0xff] %v2490_v61  ;;  %v2538_v41 = vor.u32 %v601_v55, %v597_v48  ;;  %3057 = vst [vmem:[#allocation30_spill] sm:$0xff] %v2558_v43  ;;  %1671 = vmatprep.mubr.msk.bf16.mxu1 %vm373_vm0, %v2540_v39  ;;  %v2567_v55 = vld [vmem:[%s2994_s1 + $0x140] ss:$8 sps:$4 sm:$0xff]   ;;  %v2586_v32 = vld [vmem:[%s2994_s1 + $0x274] ss:$8 sps:$4 sm:$0xff]  }
  0x49   : > { %714 = vmatpush1.bf16.msra.mxu0 %v2455_v62  ;;  %3058 = vst [vmem:[#allocation31_spill] sm:$0xff] %v2567_v55  ;;  %3061 = vst [vmem:[#allocation34_spill] sm:$0xff] %v2586_v32  ;;  %v778_v29 = vshrl.u32 %v754_v49, 16 }
  0x4a   : > { %902 = vmatpush1.bf16.msra.mxu1 %v2460_v63  ;;  %715 = vmatprep.subr.bf16.mxu0 %v2467_v30  ;;  %v2502_v63 = vld [vmem:[%s2994_s1 + $0x204] ss:$8 sps:$4 sm:$0xff]  }
  0x4b   : > { %903 = vmatprep.subr.bf16.mxu1 %v2474_v34  ;;  %3050 = vst [vmem:[#allocation23_spill] sm:$0xff] %v2502_v63  ;;  %v2536_v34 = vld [vmem:[%s2994_s1 + $0x1f0] ss:$8 sps:$4 sm:$0xff]   ;;  %1626 = vmatprep.mubr.msk.bf16.mxu0 %vm373_vm0, %v2538_v41 }
  0x4c   : > { %3055 = vst [vmem:[#allocation28_spill] sm:$0xff] %v2536_v34 }
  0x4d   : > { %716 = vmatpush1.bf16.msra.mxu0 %v2485_v59 }
  0x4e   : > { %904 = vmatpush1.bf16.msra.mxu1 %v2490_v61  ;;  %717 = vmatprep.subr.bf16.mxu0 %v2495_v57  ;;  %v2531_v61 = vld [vmem:[%s2994_s1 + $0x150] ss:$8 sps:$4 sm:$0xff]  }
  0x4f   : > { %905 = vmatprep.subr.bf16.mxu1 %v2502_v63  ;;  %3054 = vst [vmem:[#allocation27_spill] sm:$0xff] %v2531_v61  ;;  %v564_v63 = vld [vmem:[%s2280_s17 + $0x10] sm:$0x1] }
  0x50   : > { %v566_v48 = vpack.c.bf16 %v564_v63, %v562_v36  ;;  %v780_v63 = vshll.u32 %v754_v49, 16  ;;  %v2593_v36 = vld [vmem:[%s2994_s1 + $0x1d0] ss:$8 sps:$4 sm:$0xff]  }
  0x51   : > { %718 = vmatpush1.bf16.msra.mxu0 %v2507_v51 }
  0x52   : > { %906 = vmatpush1.bf16.msra.mxu1 %v2512_v44  ;;  %719 = vmatprep.subr.bf16.mxu0 %v2519_v45  ;;  %v2579_v44 = vld [vmem:[%s2994_s1 + $0x1d4] ss:$8 sps:$4 sm:$0xff]   ;;  %v592_v37 = vshll.u32 %v566_v48, 16  ;;  %v941_v45 = vld [vmem:[%s2280_s17 + $0x18] sm:$0x3] }
  0x53   : > { %907 = vmatprep.subr.bf16.mxu1 %v2524_v53  ;;  %v2574_v53 = vld [vmem:[%s2994_s1 + $0x1e0] ss:$8 sps:$4 sm:$0xff]   ;;  %3060 = vst [vmem:[#allocation33_spill] sm:$0xff] %v2579_v44  ;;  %v943_v49 = vpack.c.bf16 %v941_v45, %v939_v27  ;;  %v2649_v27 = vld [vmem:[%s2994_s1 + $0x2e4] ss:$8 sps:$4 sm:$0xff]  }
  0x54   : > { %3059 = vst [vmem:[#allocation32_spill] sm:$0xff] %v2574_v53  ;;  %v940_v45 = vld [vmem:[%s2280_s17 + $0x10] sm:$0x3] }
  0x55   : > { %720 = vmatpush1.bf16.msra.mxu0 %v2531_v61  ;;  %v782_v61 = vrot.slane %v780_v63, 1 }
  0x56   : > { %908 = vmatpush1.bf16.msra.mxu1 %v2536_v34  ;;  %721 = vmatprep.subr.bf16.mxu0 %v2545_v47  ;;  %v2605_v34 = vld [vmem:[%s2994_s1 + $0x1c4] ss:$8 sps:$4 sm:$0xff]   ;;  %v594_v47 = vrot.slane %v592_v37, 1 }
  0x57   : > { %909 = vmatprep.subr.bf16.mxu1 %v2558_v43  ;;  %v2598_v43 = vld [vmem:[%s2994_s1 + $0x270] ss:$8 sps:$4 sm:$0xff]   ;;  %v2635_v63 = vor.u32 %v782_v61, %v778_v29  ;;  %v2651_v29 = vrot.slane %v943_v49, 1  ;;  %v2660_v61 = vld [vmem:[%s2994_s1 + $0x2e0] ss:$8 sps:$4 sm:$0xff]  }
  0x58   : > { %3062 = vst [vmem:[#allocation35_spill] sm:$0xff] %v2598_v43 }
  0x59   : > { %722 = vmatpush1.bf16.msra.mxu0 %v2567_v55  ;;  %v590_v55 = vshrl.u32 %v566_v48, 16  ;;  %v2631_v48 = vld [vmem:[%s2994_s1 + $0x2f4] ss:$8 sps:$4 sm:$0xff]  }
  0x5a   : > { %910 = vmatpush1.bf16.msra.mxu1 %v2574_v53  ;;  %735 = vmatprep.subr.bf16.mxu0 %v2579_v44  ;;  %v2610_v53 = vld [vmem:[%s2994_s1 + $0x264] ss:$8 sps:$4 sm:$0xff]   ;;  %v2624_v44 = vld [vmem:[%s2994_s1 + $0x260] ss:$8 sps:$4 sm:$0xff]  }
  0x5b   : > { %923 = vmatprep.subr.bf16.mxu1 %v2586_v32  ;;  %v2619_v32 = vld [vmem:[%s2994_s1 + $0x1c0] ss:$8 sps:$4 sm:$0xff]   ;;  %v2633_v37 = vor.u32 %v594_v47, %v590_v55 }
  0x5c   : > { %v3091_v55 = vld [vmem:[#allocation32_spill] sm:$0xff] }
  0x5d   : > { %736 = vmatpush2.bf16.msra.mxu0 %v2593_v36 }
  0x5e   : > { %924 = vmatpush2.bf16.msra.mxu1 %v2598_v43  ;;  %737 = vmatprep.subr.bf16.mxu0 %v2605_v34  ;;  %v2642_v43 = vld [vmem:[%s2994_s1 + $0x2f0] ss:$8 sps:$4 sm:$0xff]  }
  0x5f   : > { %925 = vmatprep.subr.bf16.mxu1 %v2610_v53 }
  0x61   : > { %738 = vmatpush2.bf16.msra.mxu0 %v2619_v32 }
  0x62   : > { %926 = vmatpush2.bf16.msra.mxu1 %v2624_v44  ;;  %1073 = vmatprep.subr.bf16.mxu0 %v2631_v48 }
  0x63   : > { %1116 = vmatprep.subr.bf16.mxu1 %v2116_v0  ;;  %v2667_v0 = vld [vmem:[%s2994_s1 + $0x2d4] ss:$8 sps:$4 sm:$0xff]  }
  0x64   : > { %740 = vmatmul.mubr.bf16.vlgmr.msra.gmra.mxu0 %v2633_v37 }
  0x65   : > { %928 = vmatmul.mubr.bf16.vlgmr.msra.gmra.mxu1 %v2635_v63  ;;  %1074 = vmatpush1.bf16.msra.mxu0 %v2642_v43 }
  0x66   : > { %1117 = vmatpush1.bf16.msra.mxu1 %v2127_v2  ;;  %1075 = vmatprep.subr.bf16.mxu0 %v2649_v27  ;;  %v2678_v2 = vld [vmem:[%s2994_s1 + $0x2d0] ss:$8 sps:$4 sm:$0xff]  }
  0x67   : > { %1118 = vmatprep.subr.bf16.mxu1 %v2138_v4  ;;  %1712 = vmatprep.mubr.msk.bf16.mxu0 %vm373_vm0, %v2651_v29  ;;  %v2685_v4 = vld [vmem:[%s2994_s1 + $0x2c4] ss:$8 sps:$4 sm:$0xff]  }
  0x68   : > { %1713 = vmatprep.mubr.msk.bf16.mxu1 %vm373_vm0, %v2538_v41  ;;  %v938_v41 = vld [vmem:[%s2280_s17] sm:$0xfc] }
  0x69   : > { %1076 = vmatpush1.bf16.msra.mxu0 %v2660_v61  ;;  %v942_v47 = vpack.c.bf16 %v940_v45, %v938_v41 }
  0x6a   : > { %1119 = vmatpush1.bf16.msra.mxu1 %v2150_v6  ;;  %1077 = vmatprep.subr.bf16.mxu0 %v2667_v0  ;;  %v2692_v6 = vld [vmem:[%s2994_s1 + $0x2c0] ss:$8 sps:$4 sm:$0xff]  }
  0x6b   : > { %1120 = vmatprep.subr.bf16.mxu1 %v2162_v8  ;;  %v2699_v8 = vld [vmem:[%s2994_s1 + $0x2b4] ss:$8 sps:$4 sm:$0xff]  }
  0x6d   : > { %1078 = vmatpush1.bf16.msra.mxu0 %v2678_v2 }
  0x6e   : > { %1121 = vmatpush1.bf16.msra.mxu1 %v2172_v10  ;;  %1079 = vmatprep.subr.bf16.mxu0 %v2685_v4  ;;  %v2706_v10 = vld [vmem:[%s2994_s1 + $0x2b0] ss:$8 sps:$4 sm:$0xff]  }
  0x6f   : > { %1122 = vmatprep.subr.bf16.mxu1 %v2184_v12  ;;  %v2713_v12 = vld [vmem:[%s2994_s1 + $0x2a4] ss:$8 sps:$4 sm:$0xff]  }
  0x71   : > { %1080 = vmatpush1.bf16.msra.mxu0 %v2692_v6 }
  0x72   : > { %1123 = vmatpush1.bf16.msra.mxu1 %v2196_v14  ;;  %1081 = vmatprep.subr.bf16.mxu0 %v2699_v8  ;;  %v2720_v14 = vld [vmem:[%s2994_s1 + $0x2a0] ss:$8 sps:$4 sm:$0xff]  }
  0x73   : > { %1124 = vmatprep.subr.bf16.mxu1 %v2208_v16  ;;  %v2727_v16 = vld [vmem:[%s2994_s1 + $0x294] ss:$8 sps:$4 sm:$0xff]  }
  0x75   : > { %1082 = vmatpush1.bf16.msra.mxu0 %v2706_v10 }
  0x76   : > { %1125 = vmatpush1.bf16.msra.mxu1 %v2221_v18  ;;  %1083 = vmatprep.subr.bf16.mxu0 %v2713_v12  ;;  %v2734_v18 = vld [vmem:[%s2994_s1 + $0x290] ss:$8 sps:$4 sm:$0xff]  }
  0x77   : > { %1126 = vmatprep.subr.bf16.mxu1 %v2233_v20  ;;  %v2741_v20 = vld [vmem:[%s2994_s1 + $0x284] ss:$8 sps:$4 sm:$0xff]  }
  0x79   : > { %1084 = vmatpush1.bf16.msra.mxu0 %v2720_v14 }
  0x7a   : > { %1127 = vmatpush1.bf16.msra.mxu1 %v2246_v22  ;;  %1085 = vmatprep.subr.bf16.mxu0 %v2727_v16  ;;  %v2748_v22 = vld [vmem:[%s2994_s1 + $0x280] ss:$8 sps:$4 sm:$0xff]  }
  0x7b   : > { %1128 = vmatprep.subr.bf16.mxu1 %v2258_v24  ;;  %v2755_v24 = vld [vmem:[%s2994_s1 + $0x314] ss:$8 sps:$4 sm:$0xff]  }
  0x7d   : > { %1086 = vmatpush1.bf16.msra.mxu0 %v2734_v18 }
  0x7e   : > { %1129 = vmatpush1.bf16.msra.mxu1 %v2270_v26  ;;  %1087 = vmatprep.subr.bf16.mxu0 %v2741_v20  ;;  %v2762_v26 = vld [vmem:[%s2994_s1 + $0x310] ss:$8 sps:$4 sm:$0xff]  }
  0x7f   : > { %1130 = vmatprep.subr.bf16.mxu1 %v2287_v28  ;;  %v2771_v28 = vld [vmem:[%s2994_s1 + $0x304] ss:$8 sps:$4 sm:$0xff]  }
  0x81   : > { %1088 = vmatpush1.bf16.msra.mxu0 %v2748_v22 }
  0x82   : > { %1131 = vmatpush1.bf16.msra.mxu1 %v2300_v31  ;;  %1101 = vmatprep.subr.bf16.mxu0 %v2755_v24  ;;  %v2778_v31 = vld [vmem:[%s2994_s1 + $0x300] ss:$8 sps:$4 sm:$0xff]  }
  0x83   : > { %1144 = vmatprep.subr.bf16.mxu1 %v2315_v35  ;;  %v2782_v35 = vrot.slane %v942_v47, 1 }
  0x85   : > { %1102 = vmatpush2.bf16.msra.mxu0 %v2762_v26 }
  0x86   : > { %1145 = vmatpush2.bf16.msra.mxu1 %v2330_v38  ;;  %1103 = vmatprep.subr.bf16.mxu0 %v2771_v28  ;;  %v3074_v38 = vld [vmem:[#allocation11_spill] sm:$0xff] }
  0x87   : > { %1146 = vmatprep.subr.bf16.mxu1 %v2342_v40 }
  0x89   : > { %1104 = vmatpush2.bf16.msra.mxu0 %v2778_v31 }
  0x8a   : > { %1147 = vmatpush2.bf16.msra.mxu1 %v2354_v42  ;;  %1157 = vmatprep.subr.bf16.mxu0 %v2121_v1  ;;  %v3063_v1 = vld [vmem:[#allocation25_spill] sm:$0xff] }
  0x8b   : > { %1198 = vmatprep.subr.bf16.mxu1 %v2368_v46  ;;  %v3076_v42 = vld [vmem:[#allocation13_spill] sm:$0xff]  ;;  %v3077_v46 = vld [vmem:[#allocation14_spill] sm:$0xff] }
  0x8c   : > { %1106 = vmatmul.mubr.bf16.vlgmr.msra.gmra.mxu0 %v2782_v35 }
  0x8d   : > { %1149 = vmatmul.mubr.bf16.vlgmr.msra.gmra.mxu1 %v2633_v37  ;;  %1158 = vmatpush1.bf16.msra.mxu0 %v2132_v3  ;;  %v3064_v3 = vld [vmem:[#allocation5_spill] sm:$0xff]  ;;  %v3093_v37 = vld [vmem:[#allocation35_spill] sm:$0xff] }
  0x8e   : > { %1199 = vmatpush1.bf16.msra.mxu1 %v2382_v50  ;;  %1159 = vmatprep.subr.bf16.mxu0 %v2145_v5  ;;  %v3065_v5 = vld [vmem:[#allocation27_spill] sm:$0xff] }
  0x8f   : > { %1200 = vmatprep.subr.bf16.mxu1 %v2394_v52  ;;  %1714 = vmatprep.mubr.msk.bf16.mxu0 %vm373_vm0, %v2307_v33  ;;  %v3078_v50 = vld [vmem:[#allocation15_spill] sm:$0xff]  ;;  %v3080_v52 = vld [vmem:[#allocation17_spill] sm:$0xff] }
  0x90   : > { %1715 = vmatprep.mubr.msk.bf16.mxu1 %vm373_vm0, %v2540_v39  ;;  %v3075_v39 = vld [vmem:[#allocation12_spill] sm:$0xff] }
  0x91   : > { %1160 = vmatpush1.bf16.msra.mxu0 %v2156_v7  ;;  %v3066_v7 = vld [vmem:[#allocation6_spill] sm:$0xff] }
  0x92   : > { %1201 = vmatpush1.bf16.msra.mxu1 %v2407_v54  ;;  %1161 = vmatprep.subr.bf16.mxu0 %v2167_v9  ;;  %v3067_v9 = vld [vmem:[#allocation29_spill] sm:$0xff]  ;;  %v3081_v54 = vld [vmem:[#allocation18_spill] sm:$0xff] }
  0x93   : > { %1202 = vmatprep.subr.bf16.mxu1 %v2419_v56  ;;  %v3082_v56 = vld [vmem:[#allocation19_spill] sm:$0xff] }
  0x95   : > { %1162 = vmatpush1.bf16.msra.mxu0 %v2177_v11  ;;  %v3068_v11 = vld [vmem:[#allocation7_spill] sm:$0xff] }
  0x96   : > { %1203 = vmatpush1.bf16.msra.mxu1 %v2431_v58  ;;  %1163 = vmatprep.subr.bf16.mxu0 %v2191_v13  ;;  %v3069_v13 = vld [vmem:[#allocation31_spill] sm:$0xff]  ;;  %v3084_v58 = vld [vmem:[#allocation21_spill] sm:$0xff] }
  0x97   : > { %1204 = vmatprep.subr.bf16.mxu1 %v2443_v60  ;;  %v3086_v60 = vld [vmem:[#allocation23_spill] sm:$0xff] }
  0x99   : > { %1164 = vmatpush1.bf16.msra.mxu0 %v2203_v15  ;;  %v3070_v15 = vld [vmem:[#allocation8_spill] sm:$0xff] }
  0x9a   : > { %1205 = vmatpush1.bf16.msra.mxu1 %v2455_v62  ;;  %1165 = vmatprep.subr.bf16.mxu0 %v2216_v17  ;;  %v3071_v17 = vld [vmem:[#allocation33_spill] sm:$0xff]  ;;  %v3087_v62 = vld [vmem:[#allocation24_spill] sm:$0xff] }
  0x9b   : > { %1206 = vmatprep.subr.bf16.mxu1 %v2467_v30  ;;  %v3088_v30 = vld [vmem:[#allocation26_spill] sm:$0xff] }
  0x9d   : > { %1166 = vmatpush1.bf16.msra.mxu0 %v2226_v19  ;;  %v1718_v19 = vld [vmem:[%s2280_s17 + $0x28] sm:$0xfc] }
  0x9e   : > { %1207 = vmatpush1.bf16.msra.mxu1 %v2485_v59  ;;  %1167 = vmatprep.subr.bf16.mxu0 %v2241_v21  ;;  %v1720_v21 = vld [vmem:[%s2280_s17 + $0x38] sm:$0x3]  ;;  %v3085_v59 = vld [vmem:[#allocation22_spill] sm:$0xff] }
  0x9f   : > { %1208 = vmatprep.subr.bf16.mxu1 %v2495_v57  ;;  %v1289_v33 = vpack.c.bf16 %v1720_v21, %v1718_v19  ;;  %v3083_v57 = vld [vmem:[#allocation20_spill] sm:$0xff] }
  0xa0   : > { %v1363_v19 = vld [vmem:[%s2996_s3 + $0x20] sm:$0xff]  ;;  %v1362_v21 = vld [vmem:[%s2996_s3 + $0x18] sm:$0xff] }
  0xa1   : > { %1168 = vmatpush1.bf16.msra.mxu0 %v2253_v23  ;;  %v3072_v23 = vld [vmem:[#allocation9_spill] sm:$0xff]  ;;  %v1293_v40 = vrot.slane %v1289_v33, 1 }
  0xa2   : > { %1209 = vmatpush1.bf16.msra.mxu1 %v2507_v51  ;;  %1169 = vmatprep.subr.bf16.mxu0 %v2265_v25  ;;  %v3073_v25 = vld [vmem:[#allocation10_spill] sm:$0xff]  ;;  %v3079_v51 = vld [vmem:[#allocation16_spill] sm:$0xff] }
  0xa3   : > { %1210 = vmatprep.subr.bf16.mxu1 %v3063_v1  ;;  %v1359_v33 = vld [vmem:[%s2996_s3] sm:$0xff] }
  0xa5   : > { %1170 = vmatpush1.bf16.msra.mxu0 %v3064_v3  ;;  %v1366_v3 = vld [vmem:[%s2996_s3 + $0x38] sm:$0xff] }
  0xa6   : > { %1211 = vmatpush1.bf16.msra.mxu1 %v3065_v5  ;;  %1171 = vmatprep.subr.bf16.mxu0 %v3066_v7 }
  0xa7   : > { %1212 = vmatprep.subr.bf16.mxu1 %v3067_v9 }
  0xa9   : > { %1172 = vmatpush1.bf16.msra.mxu0 %v3068_v11  ;;  %v1365_v11 = vld [vmem:[%s2996_s3 + $0x30] sm:$0xff] }
  0xaa   : > { %1213 = vmatpush1.bf16.msra.mxu1 %v3069_v13  ;;  %1185 = vmatprep.subr.bf16.mxu0 %v3070_v15 }
  0xab   : > { %1226 = vmatprep.subr.bf16.mxu1 %v3071_v17  ;;  %v1364_v17 = vld [vmem:[%s2996_s3 + $0x28] sm:$0xff] }
  0xad   : > { %1186 = vmatpush2.bf16.msra.mxu0 %v3072_v23  ;;  %v1361_v23 = vld [vmem:[%s2996_s3 + $0x10] sm:$0xff] }
  0xae   : > { %1227 = vmatpush2.bf16.msra.mxu1 %v2593_v36  ;;  %1187 = vmatprep.subr.bf16.mxu0 %v3073_v25  ;;  %v1719_v36 = vld [vmem:[%s2280_s17 + $0x30] sm:$0x3]  ;;  %v1360_v25 = vld [vmem:[%s2996_s3 + $0x8] sm:$0xff] }
  0xaf   : > { %1228 = vmatprep.subr.bf16.mxu1 %v2605_v34  ;;  %v3089_v34 = vld [vmem:[#allocation28_spill] sm:$0xff] }
  0xb1   : > { %1188 = vmatpush2.bf16.msra.mxu0 %v3074_v38 }
  0xb2   : > { %1229 = vmatpush2.bf16.msra.mxu1 %v2619_v32  ;;  %1241 = vmatprep.subr.bf16.mxu0 %v3075_v39  ;;  %v1717_v32 = vld [vmem:[%s2280_s17 + $0x20] sm:$0xfc] }
  0xb3   : > { %1298 = vmatprep.subr.bf16.mxu1 %v2631_v48  ;;  %v3092_v48 = vld [vmem:[#allocation34_spill] sm:$0xff]  ;;  %v1288_v49 = vpack.c.bf16 %v1719_v36, %v1717_v32 }
  0xb4   : > { %1190 = vmatmul.mubr.bf16.vlgmr.msra.gmra.mxu0 %v3076_v42 }
  0xb5   : > { %1231 = vmatmul.mubr.bf16.vlgmr.msra.gmra.mxu1 %v2635_v63  ;;  %1242 = vmatpush1.bf16.msra.mxu0 %v3077_v46  ;;  %v1292_v63 = vrot.slane %v1288_v49, 1 }
  0xb6   : > { %1299 = vmatpush1.bf16.msra.mxu1 %v2642_v43  ;;  %1243 = vmatprep.subr.bf16.mxu0 %v3078_v50  ;;  %v3090_v43 = vld [vmem:[#allocation30_spill] sm:$0xff] }
  0xb7   : > { %1300 = vmatprep.subr.bf16.mxu1 %v2649_v27  ;;  %1716 = vmatprep.mubr.msk.bf16.mxu0 %vm373_vm0, %v2651_v29  ;;  %v1374_v27 = vld [vmem:[%s2996_s3 + $0x78] sm:$0xff]  ;;  %v2032_v29 = vmov 0.0  }
  0xb8   : > { %1721 = vmatprep.mubr.msk.bf16.mxu1 %vm373_vm0, %v1293_v40 }
  0xb9   : > { %1244 = vmatpush1.bf16.msra.mxu0 %v3079_v51 }
  0xba   : > { %1301 = vmatpush1.bf16.msra.mxu1 %v2660_v61  ;;  %1245 = vmatprep.subr.bf16.mxu0 %v3080_v52 }
  0xbb   : > { %1302 = vmatprep.subr.bf16.mxu1 %v2667_v0 }
  0xbd   : > { %1246 = vmatpush1.bf16.msra.mxu0 %v3081_v54 }
  0xbe   : > { %1303 = vmatpush1.bf16.msra.mxu1 %v2678_v2  ;;  %1247 = vmatprep.subr.bf16.mxu0 %v3082_v56 }
  0xbf   : > { %1304 = vmatprep.subr.bf16.mxu1 %v2685_v4 }
  0xc1   : > { %1248 = vmatpush1.bf16.msra.mxu0 %v3083_v57 }
  0xc2   : > { %1305 = vmatpush1.bf16.msra.mxu1 %v2692_v6  ;;  %1249 = vmatprep.subr.bf16.mxu0 %v3084_v58 }
  0xc3   : > { %1306 = vmatprep.subr.bf16.mxu1 %v2699_v8 }
  0xc5   : > { %1250 = vmatpush1.bf16.msra.mxu0 %v3085_v59 }
  0xc6   : > { %1307 = vmatpush1.bf16.msra.mxu1 %v2706_v10  ;;  %1251 = vmatprep.subr.bf16.mxu0 %v3086_v60 }
  0xc7   : > { %1308 = vmatprep.subr.bf16.mxu1 %v2713_v12 }
  0xc9   : > { %1252 = vmatpush1.bf16.msra.mxu0 %v3087_v62 }
  0xca   : > { %1309 = vmatpush1.bf16.msra.mxu1 %v2720_v14  ;;  %1253 = vmatprep.subr.bf16.mxu0 %v3088_v30 }
  0xcb   : > { %1310 = vmatprep.subr.bf16.mxu1 %v2727_v16  ;;  %v1372_v16 = vld [vmem:[%s2996_s3 + $0x68] sm:$0xff] }
  0xcd   : > { %1254 = vmatpush1.bf16.msra.mxu0 %v3089_v34 }
  0xce   : > { %1311 = vmatpush1.bf16.msra.mxu1 %v2734_v18  ;;  %1255 = vmatprep.subr.bf16.mxu0 %v3090_v43  ;;  %v1371_v18 = vld [vmem:[%s2996_s3 + $0x60] sm:$0xff] }
  0xcf   : > { %1312 = vmatprep.subr.bf16.mxu1 %v2741_v20  ;;  %v1370_v20 = vld [vmem:[%s2996_s3 + $0x58] sm:$0xff] }
  0xd1   : > { %1256 = vmatpush1.bf16.msra.mxu0 %v3091_v55 }
  0xd2   : > { %1313 = vmatpush1.bf16.msra.mxu1 %v2748_v22  ;;  %1269 = vmatprep.subr.bf16.mxu0 %v3092_v48  ;;  %v1369_v22 = vld [vmem:[%s2996_s3 + $0x50] sm:$0xff] }
  0xd3   : > { %1326 = vmatprep.subr.bf16.mxu1 %v2755_v24  ;;  %v1368_v24 = vld [vmem:[%s2996_s3 + $0x48] sm:$0xff] }
  0xd5   : > { %1270 = vmatpush2.bf16.msra.mxu0 %v3093_v37 }
  0xd6   : > { %1327 = vmatpush2.bf16.msra.mxu1 %v2762_v26  ;;  %1271 = vmatprep.subr.bf16.mxu0 %v2610_v53  ;;  %v1373_v53 = vld [vmem:[%s2996_s3 + $0x70] sm:$0xff] }
  0xd7   : > { %1328 = vmatprep.subr.bf16.mxu1 %v2771_v28  ;;  %v1367_v28 = vld [vmem:[%s2996_s3 + $0x40] sm:$0xff] }
  0xd9   : > { %1272 = vmatpush2.bf16.msra.mxu0 %v2624_v44 }
  0xda   : > { %1329 = vmatpush2.bf16.msra.mxu1 %v2778_v31  ;;  %1744 = vmatprep.subr.mxu0 %v2032_v29 }
  0xdc   : > { %1274 = vmatmul.mubr.bf16.vlgmr.msra.gmra.mxu0 %v2782_v35 }
  0xdd   : > { %1331 = vmatmul.mubr.bf16.vlgmr.msra.gmra.mxu1 %v1292_v63  ;;  %1745 = vmatpush3.msra.mxu0 %v1374_v27 }
  0xde   : > { %1746 = vmatprep.subr.mxu0 %v2032_v29  ;;  %1776 = vmatprep.mubr.msk.f32.mxu0 %vm2033_vm1, %v2032_v29 }
  0xdf   : > { %1747 = vmatpush3.msra.mxu0 %v1373_v53 }
  0xe0   : > { %1748 = vmatprep.subr.mxu0 %v2032_v29 }
  0xe1   : > { %1749 = vmatpush3.msra.mxu0 %v1372_v16 }
  0xe2   : > { %1750 = vmatprep.subr.mxu0 %v2032_v29 }
  0xe3   : > { %1751 = vmatpush3.msra.mxu0 %v1371_v18 }
  0xe4   : > { %1752 = vmatprep.subr.mxu0 %v2032_v29 }
  0xe5   : > { %1753 = vmatpush3.msra.mxu0 %v1370_v20 }
  0xe6   : > { %1754 = vmatprep.subr.mxu0 %v2032_v29 }
  0xe7   : > { %1755 = vmatpush3.msra.mxu0 %v1369_v22 }
  0xe8   : > { %1756 = vmatprep.subr.mxu0 %v2032_v29 }
  0xe9   : > { %1757 = vmatpush3.msra.mxu0 %v1368_v24 }
  0xea   : > { %1758 = vmatprep.subr.mxu0 %v2032_v29 }
  0xeb   : > { %1759 = vmatpush3.msra.mxu0 %v1367_v28  ;;  %v1375_v28 = vld [vmem:[%s2997_s4] sm:$0x1] }
  0xec   : > { %1760 = vmatprep.subr.mxu0 %v2032_v29 }
  0xed   : > { %1761 = vmatpush3.msra.mxu0 %v1366_v3 }
  0xee   : > { %1762 = vmatprep.subr.mxu0 %v2032_v29 }
  0xef   : > { %1763 = vmatpush3.msra.mxu0 %v1365_v11 }
  0xf0   : > { %1764 = vmatprep.subr.mxu0 %v2032_v29 }
  0xf1   : > { %1765 = vmatpush3.msra.mxu0 %v1364_v17 }
  0xf2   : > { %1766 = vmatprep.subr.mxu0 %v2032_v29 }
  0xf3   : > { %1767 = vmatpush3.msra.mxu0 %v1363_v19 }
  0xf4   : > { %1768 = vmatprep.subr.mxu0 %v2032_v29 }
  0xf5   : > { %1769 = vmatpush3.msra.mxu0 %v1362_v21 }
  0xf6   : > { %1770 = vmatprep.subr.mxu0 %v2032_v29 }
  0xf7   : > { %1771 = vmatpush3.msra.mxu0 %v1361_v23 }
  0xf8   : > { %1772 = vmatprep.subr.mxu0 %v2032_v29 }
  0xf9   : > { %1773 = vmatpush3.msra.mxu0 %v1360_v25 }
  0xfa   : > { %1774 = vmatprep.subr.mxu0 %v2032_v29 }
  0xfb   : > { %1775 = vmatpush3.msra.mxu0 %v1359_v33 }
  0xfc   : > { %v411_v61 = vpop.f32.mrf.mxu0 }
  0xfd   : > { %v555_v0 = vpop.f32.mrf.mxu1 }
  0xfe   : > { %v556_v44 = vadd.f32 %v555_v0, %v411_v61  ;;  %v413_v2 = vpop.f32.mrf.mxu0 }
  0xff   : > { %v557_v4 = vpop.f32.mrf.mxu1 }
 0x100   : > { %v558_v6 = vadd.f32 %v557_v4, %v413_v2  ;;  %v415_v8 = vpop.f32.mrf.mxu0 }
 0x101   : > { %v559_v10 = vpop.f32.mrf.mxu1 }
 0x102   : > { %v416_v12 = vpop.f32.mrf.mxu0 }
 0x103   : > { %v560_v14 = vpop.f32.mrf.mxu1  ;;  %v1722_v12 = vld [vmem:[%s2995_s2] ss:$0 sm:$0xff] }
 0x124   : > { %v741_v26 = vpop.f32.mrf.mxu0 }
 0x125   : > { %v929_v41 = vpop.f32.mrf.mxu1  ;;  %v748_v45 = vadd.f32 %v741_v26, %v556_v44 }
 0x126   : > { %v743_v47 = vpop.f32.mrf.mxu0 }
 0x127   : > { %v931_v31 = vpop.f32.mrf.mxu1  ;;  %v936_v35 = vadd.f32 %v929_v41, %v748_v45  ;;  %v749_v1 = vadd.f32 %v743_v47, %v558_v6 }
 0x128   : > { %v745_v5 = vpop.f32.mrf.mxu0 }
 0x129   : > { %v933_v7 = vpop.f32.mrf.mxu1  ;;  %v937_v9 = vadd.f32 %v931_v31, %v749_v1 }
 0x12a   : > { %v746_v13 = vpop.f32.mrf.mxu0 }
 0x12b   : > { %v934_v15 = vpop.f32.mrf.mxu1 }
 0x14c   : > { %v1107_v38 = vpop.f32.mrf.mxu0 }
 0x14d   : > { %v1150_v39 = vpop.f32.mrf.mxu1  ;;  %v1114_v40 = vadd.f32 %v1107_v38, %v936_v35 }
 0x14e   : > { %v1109_v42 = vpop.f32.mrf.mxu0 }
 0x14f   : > { %v1152_v46 = vpop.f32.mrf.mxu1  ;;  %v1115_v50 = vadd.f32 %v1109_v42, %v937_v9 }
 0x150   : > { %v1111_v51 = vpop.f32.mrf.mxu0 }
 0x151   : > { %v1154_v52 = vpop.f32.mrf.mxu1 }
 0x152   : > { %v1112_v54 = vpop.f32.mrf.mxu0 }
 0x153   : > { %v1155_v56 = vpop.f32.mrf.mxu1 }
 0x174   : > { %v1191_v57 = vpop.f32.mrf.mxu0 }
 0x175   : > { %v1232_v58 = vpop.f32.mrf.mxu1  ;;  %v1192_v55 = vadd.f32 %v1191_v57, %v1150_v39 }
 0x176   : > { %v1193_v59 = vpop.f32.mrf.mxu0 }
 0x177   : > { %v1234_v60 = vpop.f32.mrf.mxu1  ;;  %v1194_v32 = vadd.f32 %v1193_v59, %v1152_v46  ;;  %v1239_v36 = vadd.f32 %v1232_v58, %v1192_v55 }
 0x178   : > { %v1195_v62 = vpop.f32.mrf.mxu0 }
 0x179   : > { %v1236_v30 = vpop.f32.mrf.mxu1  ;;  %v1240_v37 = vadd.f32 %v1234_v60, %v1194_v32 }
 0x17a   : > { %v1196_v34 = vpop.f32.mrf.mxu0 }
 0x17b   : > { %v1237_v43 = vpop.f32.mrf.mxu1 }
 0x19c   : > { %v1275_v48 = vpop.f32.mrf.mxu0 }
 0x19d   : > { %v1332_v49 = vpop.f32.mrf.mxu1  ;;  %v1282_v63 = vadd.f32 %v1275_v48, %v1239_v36 }
 0x19e   : > { %v1277_v27 = vpop.f32.mrf.mxu0 }
 0x19f   : > { %v1334_v29 = vpop.f32.mrf.mxu1  ;;  %v1339_v53 = vadd.f32 %v1332_v49, %v1282_v63  ;;  %v1283_v61 = vadd.f32 %v1277_v27, %v1240_v37 }
 0x1a0   : > { %v1279_v0 = vpop.f32.mrf.mxu0 }
 0x1a1   : > { %v1336_v44 = vpop.f32.mrf.mxu1  ;;  %v1341_v2 = vmax.f32 %v1114_v40, %v1339_v53  ;;  %v1340_v4 = vadd.f32 %v1334_v29, %v1283_v61 }
 0x1a2   : > { %v1280_v6 = vpop.f32.mrf.mxu0 }
 0x1a3   : > { %v1337_v8 = vpop.f32.mrf.mxu1  ;;  %v1342_v10 = vmax.f32 %v1115_v50, %v1340_v4 }
 0x1a5   : > { %v1343_v14 = vmax.f32 %v1341_v2, %v1342_v10 }
 0x1a7   : > { %v1351_v16 = vadd.f32 %v1722_v12, %v1343_v14 }
 0x1a9   : > { %v1352_v18 = vmax.f32 %v1351_v16, 0.0 }
 0x1ab   : > { %v1353_v20 = vrot.slane %v1352_v18, 4 }
 0x1ad   : > { %v1354_v22 = vadd.f32 %v1353_v20, %v1352_v18 }
 0x1af   : > { %v1355_v24 = vrot.slane %v1354_v22, 2 }
 0x1b1   : > { %v1356_v26 = vadd.f32 %v1355_v24, %v1354_v22 }
 0x1b3   : > { %v1357_v41 = vrot.slane %v1356_v26, 1 }
 0x1b5   : > { %v1358_v45 = vadd.f32 %v1357_v41, %v1356_v26 }
 0x1b7   : > { %1777 = vmatmul.mubr.f32.vlgmr.msra.gmra.mxu0 %v1358_v45 }
 0x277   : > { %v1442_v47 = vpop.f32.mrf.mxu0 }
 0x278   : > { %v1443_v31 = vadd.f32 %v1442_v47, %v1375_v28 }
 0x279   : > { %v1778_v35 = vpop.f32.mrf.mxu0 }
 0x27a   : > { %1447 = vst.msk [vmem:[%s216_s16] sm:$0x1] %vm1446_vm2, %v1443_v31 }
 0x27b   : > { %1983 = shalt.err (!%p1980_p3)
}
 0x27c   : > { %s1984_s10 = scalar_lea.hbm %s2958_s30, 16  ;;  %s1988_s12 = scalar_lea.hbm %s2998_s5, 32 }
 0x27d   : > { %p1985_p4 = scmp.ne.s32.totalorder %s2958_s30, %s1984_s10  ;;  %p1989_p9 = scmp.lt.s32.totalorder %s2958_s30, %s2998_s5 }
 0x27e   : > { %p1990_p10 = scmp.lt.s32.totalorder %s1988_s12, %s1984_s10 }
 0x27f   : > { %p1986_p7 = pnand %p1985_p4, %p2103_p5 }
 0x280   : > { %p1991_p11 = por %p1990_p10, %p1989_p9 }
 0x281   : > { %p1987_p8 = pneg %p1986_p7 }
 0x283   : > { %p1992_p12 = pnand %p1991_p11, %p1987_p8 }
 0x285   : > { %1995 = shalt.err (!%p1992_p12)
}
 0x286   : > { %1779 = dma.vmem_to_hbm [thread:$0]  (%p2103_p5), %s1462_s23, 16, %s2958_s30, %s1449_s6  }
 0x287 PF: > { %p1785_p13 = scmp.ge.s32.totalorder %s2030_s21, 2  ;;  %s1473_s15 = sand.u32 1, %s2018_s18  }
 0x288   : > { %s1474_s16 = scalar_lea.sflag [#allocation3], %s1473_s15 }
 0x289   : > { %p1782_p0 = pnand %p1785_p13, %p2107_p6 }
 0x28b   : > { %p1783_p1 = pneg %p1782_p0 }
 0x28d   : > { %2013 = dma.done.wait (%p1783_p1), %s1474_s16, 16  }
 0x28e   : > { %2015 = vsyncadd (%p1783_p1), %s1474_s16, 4294967280  ;;  %p15_p2 = scmp.ge.s32.totalorder %s2090_s24, 4   ;;  %s3094_s18 = smov %s2022_s19 }
 0x28f   : > { %s3095_s19 = smov %s2026_s20  ;;  %s3096_s20 = smov %s2101_s27 }
 0x290   : > { %s3097_s21 = smov %s2090_s24  ;;  %17 = sbr.rel (!%p15_p2) target bundleno = 3 (0x3), region = 80 }
 0x295   :  { %1478 = vsyncpa [#allocation3], 1 }
 0x296   :  { %1480 = vsyncpa [#allocation3 + $0x1], 1 }

</bundles_post_ra>
